<compile_context>
chip_gen: v5e
topology: v5e:2x2
jax: 0.10.0
libtpu: 0.0.40
codegen_flags: <defaults>
</compile_context>

<pallas_src>
import math
import jax
import jax.numpy as jnp
from jax.experimental import pallas as pl
from jax.experimental.pallas import tpu as pltpu

# ----- static configuration (small shapes) -----
B = 2          # batch
S = 8          # decoder sequence length
S_ENC = 8      # encoder sequence length
D_MODEL = 32   # d_model
N_HEAD = 4     # heads
D_HEAD = D_MODEL // N_HEAD
FFN = 64       # ffn_hidden
EPS = 1e-12
NEG_INF = -1.0e9

# dvecs row layout (all rows are D_MODEL wide)
_B_SELF = 0    # rows 0..3 : self-attn  q,k,v,o biases (q already scale-folded)
_B_CROSS = 4   # rows 4..7 : cross-attn q,k,v,o biases (q already scale-folded)
_LN = 8        # rows 8..13: ln1_g, ln1_b, ln2_g, ln2_b, ln3_g, ln3_b
_FFN_B2 = 14   # row 14    : FFN second-layer bias


def decoder_layer_kernel(dec_ref, enc_ref, trg_bias_ref, src_bias_ref,
                         attn_w_ref, dvecs_ref, ffn_w1_ref, ffn_b1_ref,
                         ffn_w2_ref, out_ref):
    # Parameters are read from VMEM refs at point of use; nothing is hoisted.

    def vec(i):                           # (1, D) row of the packed D-wide vectors
        return dvecs_ref[i:i + 1, :]

    def layernorm(x, gi, bi):
        # torch.var default: unbiased (N-1), eps=1e-12
        mean = jnp.mean(x, axis=-1, keepdims=True)
        diff = x - mean
        var = jnp.sum(diff * diff, axis=-1, keepdims=True) * (1.0 / (x.shape[-1] - 1))
        return vec(gi) * (diff * jax.lax.rsqrt(var + EPS)) + vec(bi)

    def split_heads(t, s_len):
        # (B*s_len, D) -> (B*H, s_len, dh): lane-slice per head, fold (b, h) onto one
        # leading batch axis. Only lane slices + leading-dim reshapes (no transposes).
        parts = [t[:, h * D_HEAD:(h + 1) * D_HEAD].reshape(B, s_len, D_HEAD)
                 for h in range(N_HEAD)]
        return jnp.stack(parts, axis=1).reshape(B * N_HEAD, s_len, D_HEAD)

    def merge_heads(o):
        # (B*H, S, dh) -> (B*S, D): inverse of split_heads (lane-axis concat over heads).
        o4 = o.reshape(B, N_HEAD, S, D_HEAD)
        return jnp.concatenate(
            [o4[:, h].reshape(B * S, D_HEAD) for h in range(N_HEAD)], axis=-1)

    def mha(m, x_q, x_kv, s_k, bias, b_base):
        # m: 0 = self attention, 1 = cross attention.
        # x_q: (B*S, D); x_kv: (B*s_k, D); bias: additive mask (B*H, S, s_k).
        # Full-width projections on the flattened batch (1/sqrt(dh) folded into Wq/bq).
        q = jnp.dot(x_q, attn_w_ref[m, 0],
                    preferred_element_type=jnp.float32) + vec(b_base)
        k = jnp.dot(x_kv, attn_w_ref[m, 1],
                    preferred_element_type=jnp.float32) + vec(b_base + 1)
        v = jnp.dot(x_kv, attn_w_ref[m, 2],
                    preferred_element_type=jnp.float32) + vec(b_base + 2)

        qh = split_heads(q, S)            # (B*H, S,   dh)
        kh = split_heads(k, s_k)          # (B*H, s_k, dh)
        vh = split_heads(v, s_k)

        scores = jnp.einsum('gqe,gke->gqk', qh, kh,
                            preferred_element_type=jnp.float32) + bias
        scores = scores - jnp.max(scores, axis=-1, keepdims=True)
        p = jnp.exp(scores)
        attn = p * pl.reciprocal(jnp.sum(p, axis=-1, keepdims=True), approx=False)
        o = jnp.einsum('gqk,gke->gqe', attn, vh,
                       preferred_element_type=jnp.float32)      # (B*H, S, dh)

        # Single output projection against the unsplit Wo (accumulation on the MXU).
        return jnp.dot(merge_heads(o), attn_w_ref[m, 3],
                       preferred_element_type=jnp.float32) + vec(b_base + 3)

    x = dec_ref[...]                      # (B*S,     D)
    enc = enc_ref[...]                    # (B*S_enc, D)

    # --- self attention + residual + LN1 ---
    x = layernorm(x + mha(0, x, x, S, trg_bias_ref[...], _B_SELF), _LN + 0, _LN + 1)
    # --- cross attention + residual + LN2 ---
    x = layernorm(x + mha(1, x, enc, S_ENC, src_bias_ref[...], _B_CROSS), _LN + 2, _LN + 3)
    # --- positionwise FFN + residual + LN3 ---
    hdn = jnp.maximum(
        jnp.dot(x, ffn_w1_ref[...], preferred_element_type=jnp.float32) + ffn_b1_ref[...],
        0.0)
    f = jnp.dot(hdn, ffn_w2_ref[...], preferred_element_type=jnp.float32) + vec(_FFN_B2)
    x = layernorm(x + f, _LN + 4, _LN + 5)

    out_ref[...] = x.astype(out_ref.dtype)


def decoder_layer(dec_out, enc_out, trg_mask, src_mask, params):
    (mha1_w, mha1_b, mha2_w, mha2_b, ln_g, ln_b, w1, b1, w2, b2) = params
    Bn, Sn, Dn = dec_out.shape
    Se = enc_out.shape[1]

    # ---- host-side parameter repacking (pure JAX, outside the kernel) ----
    # Fold 1/sqrt(d_head) into Wq / bq; keep all weights as unsplit (D, D) [in, out].
    s_vec = jnp.asarray([1.0 / math.sqrt(D_HEAD), 1.0, 1.0, 1.0], jnp.float32)
    attn_w = jnp.stack([mha1_w, mha2_w]) * s_vec[None, :, None, None]   # (2, 4, D, D)
    attn_bv = jnp.stack([mha1_b, mha2_b]) * s_vec[None, :, None]        # (2, 4, D)

    # All D-wide vectors packed densely into one (15, D) slab.
    dvecs = jnp.concatenate(
        [attn_bv.reshape(8, Dn),
         jnp.stack([ln_g[0], ln_b[0], ln_g[1], ln_b[1], ln_g[2], ln_b[2]]),
         b2.reshape(1, Dn)], axis=0)                                    # (15, D)

    # Additive masks ((mask != 0) ? 0 : -1e9), pre-broadcast over heads -> (B*H, S, S_k).
    trg_bias = jnp.where(trg_mask == 0, NEG_INF, 0.0).astype(jnp.float32)
    src_bias = jnp.where(src_mask == 0, NEG_INF, 0.0).astype(jnp.float32)
    trg_bias_g = jnp.broadcast_to(trg_bias[:, None], (Bn, N_HEAD, Sn, Sn)
                                  ).reshape(Bn * N_HEAD, Sn, Sn)
    src_bias_g = jnp.broadcast_to(src_bias[:, None], (Bn, N_HEAD, Sn, Se)
                                  ).reshape(Bn * N_HEAD, Sn, Se)

    # Flatten batch: projections / FFN / LayerNorms run once on (B*S, D).
    dec2d = dec_out.reshape(Bn * Sn, Dn)
    enc2d = enc_out.reshape(Bn * Se, Dn)

    operands = (dec2d, enc2d, trg_bias_g, src_bias_g,
                attn_w, dvecs, w1, b1, w2)

    def full_spec(a):
        zeros = (0,) * a.ndim
        return pl.BlockSpec(a.shape, lambda i, z=zeros: z)

    out2d = pl.pallas_call(
        decoder_layer_kernel,
        out_shape=jax.ShapeDtypeStruct((Bn * Sn, Dn), jnp.float32),
        grid=(1,),                        # whole (<1 MiB) problem resident in VMEM
        in_specs=[full_spec(a) for a in operands],
        out_specs=pl.BlockSpec((Bn * Sn, Dn), lambda i: (0, 0)),
        compiler_params=pltpu.CompilerParams(dimension_semantics=("arbitrary",)),
    )(*operands)
    return out2d.reshape(Bn, Sn, Dn)


# ---------------- pure-JAX reference (for verification only) ----------------
def _ref_layernorm(x, g, b):
    d = x.shape[-1]
    mean = jnp.mean(x, -1, keepdims=True)
    var = jnp.sum((x - mean) ** 2, -1, keepdims=True) / (d - 1)
    return g * (x - mean) / jnp.sqrt(var + EPS) + b


def _ref_mha(q_in, kv_in, w, bvec, mask):
    q = q_in @ w[0] + bvec[0]
    k = kv_in @ w[1] + bvec[1]
    v = kv_in @ w[2] + bvec[2]

    def split(t):
        Bn, Sn, _ = t.shape
        return t.reshape(Bn, Sn, N_HEAD, D_HEAD).transpose(0, 2, 1, 3)

    qh, kh, vh = split(q), split(k), split(v)
    scores = jnp.einsum("bhqd,bhkd->bhqk", qh, kh) / math.sqrt(D_HEAD)
    scores = jnp.where(mask[:, None, :, :] == 0, -1.0e9, scores)
    attn = jax.nn.softmax(scores, axis=-1)
    o = jnp.einsum("bhqk,bhkd->bhqd", attn, vh)
    o = o.transpose(0, 2, 1, 3).reshape(q_in.shape[0], q_in.shape[1], D_MODEL)
    return o @ w[3] + bvec[3]


def _ref_decoder_layer(dec_out, enc_out, trg_mask, src_mask, params):
    (m1w, m1b, m2w, m2b, ln_g, ln_b, w1, b1, w2, b2) = params
    x = _ref_layernorm(dec_out + _ref_mha(dec_out, dec_out, m1w, m1b, trg_mask),
                       ln_g[0], ln_b[0])
    x = _ref_layernorm(x + _ref_mha(x, enc_out, m2w, m2b, src_mask),
                       ln_g[1], ln_b[1])
    h = jnp.maximum(x @ w1 + b1, 0.0)
    x = _ref_layernorm(x + (h @ w2 + b2), ln_g[2], ln_b[2])
    return x


# ---------------- main ----------------
if __name__ == "__main__":
    key = jax.random.PRNGKey(0)
    ks = jax.random.split(key, 12)

    dec_out = jax.random.normal(ks[0], (B, S, D_MODEL), dtype=jnp.float32)
    enc_out = jax.random.normal(ks[1], (B, S_ENC, D_MODEL), dtype=jnp.float32)

    # causal target mask, all-ones source mask (float, nonzero == visible)
    trg_mask = jnp.tril(jnp.ones((S, S), dtype=jnp.float32))[None].repeat(B, axis=0)
    src_mask = jnp.ones((B, S, S_ENC), dtype=jnp.float32)

    wscale = 0.1
    mha1_w = wscale * jax.random.normal(ks[2], (4, D_MODEL, D_MODEL), jnp.float32)
    mha1_b = wscale * jax.random.normal(ks[3], (4, D_MODEL), jnp.float32)
    mha2_w = wscale * jax.random.normal(ks[4], (4, D_MODEL, D_MODEL), jnp.float32)
    mha2_b = wscale * jax.random.normal(ks[5], (4, D_MODEL), jnp.float32)
    ln_g = jnp.ones((3, D_MODEL), jnp.float32)     # LayerNorm gammas (ln1, ln2, ln3)
    ln_b = jnp.zeros((3, D_MODEL), jnp.float32)    # LayerNorm betas
    w1 = wscale * jax.random.normal(ks[6], (D_MODEL, FFN), jnp.float32)
    b1 = wscale * jax.random.normal(ks[7], (1, FFN), jnp.float32)
    w2 = wscale * jax.random.normal(ks[8], (FFN, D_MODEL), jnp.float32)
    b2 = wscale * jax.random.normal(ks[9], (1, D_MODEL), jnp.float32)

    params = (mha1_w, mha1_b, mha2_w, mha2_b, ln_g, ln_b, w1, b1, w2, b2)

    out = decoder_layer(dec_out, enc_out, trg_mask, src_mask, params)
    out = jax.block_until_ready(out)

    ref = _ref_decoder_layer(dec_out, enc_out, trg_mask, src_mask, params)
    assert out.shape == (B, S, D_MODEL)
    assert jnp.allclose(out, ref, atol=1e-4, rtol=1e-4), "mismatch vs reference"

    print("KERNEL_OK")
</pallas_src>

<mosaic_0001>
module attributes {stable_mosaic.version = 11 : i64} {
  func.func @decoder_layer_kernel(%arg0: i32, %arg1: memref<16x32xf32, #tpu.memory_space<vmem>>, %arg2: memref<16x32xf32, #tpu.memory_space<vmem>>, %arg3: memref<8x8x8xf32, #tpu.memory_space<vmem>>, %arg4: memref<8x8x8xf32, #tpu.memory_space<vmem>>, %arg5: memref<2x4x32x32xf32, #tpu.memory_space<vmem>>, %arg6: memref<15x32xf32, #tpu.memory_space<vmem>>, %arg7: memref<32x64xf32, #tpu.memory_space<vmem>>, %arg8: memref<1x64xf32, #tpu.memory_space<vmem>>, %arg9: memref<64x32xf32, #tpu.memory_space<vmem>>, %arg10: memref<16x32xf32, #tpu.memory_space<vmem>>) attributes {dimension_semantics = [#tpu.dimension_semantics<arbitrary>], iteration_bounds = array<i64: 1>, scalar_prefetch = 0 : i64, scratch_operands = 0 : i64, tpu.core_type = #tpu.core_type<tc>, window_params = [{pipeline_mode = #tpu.pipeline_mode<synchronous>, transform_indices = @transform_0, window_bounds = array<i64: 16, 32>}, {pipeline_mode = #tpu.pipeline_mode<synchronous>, transform_indices = @transform_1, window_bounds = array<i64: 16, 32>}, {pipeline_mode = #tpu.pipeline_mode<synchronous>, transform_indices = @transform_2, window_bounds = array<i64: 8, 8, 8>}, {pipeline_mode = #tpu.pipeline_mode<synchronous>, transform_indices = @transform_3, window_bounds = array<i64: 8, 8, 8>}, {pipeline_mode = #tpu.pipeline_mode<synchronous>, transform_indices = @transform_4, window_bounds = array<i64: 2, 4, 32, 32>}, {pipeline_mode = #tpu.pipeline_mode<synchronous>, transform_indices = @transform_5, window_bounds = array<i64: 15, 32>}, {pipeline_mode = #tpu.pipeline_mode<synchronous>, transform_indices = @transform_6, window_bounds = array<i64: 32, 64>}, {pipeline_mode = #tpu.pipeline_mode<synchronous>, transform_indices = @transform_7, window_bounds = array<i64: 1, 64>}, {pipeline_mode = #tpu.pipeline_mode<synchronous>, transform_indices = @transform_8, window_bounds = array<i64: 64, 32>}, {pipeline_mode = #tpu.pipeline_mode<synchronous>, transform_indices = @transform_9, window_bounds = array<i64: 16, 32>}]} {
    %c0 = arith.constant 0 : index
    %c0_0 = arith.constant 0 : index
    %0 = vector.load %arg1[%c0, %c0_0] : memref<16x32xf32, #tpu.memory_space<vmem>>, vector<16x32xf32>
    %c0_1 = arith.constant 0 : index
    %c0_2 = arith.constant 0 : index
    %1 = vector.load %arg2[%c0_1, %c0_2] : memref<16x32xf32, #tpu.memory_space<vmem>>, vector<16x32xf32>
    %c0_3 = arith.constant 0 : index
    %c0_4 = arith.constant 0 : index
    %c0_5 = arith.constant 0 : index
    %2 = vector.load %arg3[%c0_3, %c0_4, %c0_5] : memref<8x8x8xf32, #tpu.memory_space<vmem>>, vector<8x8x8xf32>
    %c0_6 = arith.constant 0 : index
    %c0_7 = arith.constant 0 : index
    %c0_8 = arith.constant 0 : index
    %c0_9 = arith.constant 0 : index
    %3 = vector.load %arg5[%c0_6, %c0_7, %c0_8, %c0_9] : memref<2x4x32x32xf32, #tpu.memory_space<vmem>>, vector<1x1x32x32xf32>
    %4 = vector.shape_cast %3 : vector<1x1x32x32xf32> to vector<32x32xf32>
    %cst = arith.constant dense<0.000000e+00> : vector<16x32xf32>
    %5 = tpu.matmul %0, %4, %cst {dimension_numbers = #tpu.dot_dimension_numbers<[1], [0], [0], [1], [0, 0, 1, 1], [], []>} : vector<16x32xf32>, vector<32x32xf32>, vector<16x32xf32> -> vector<16x32xf32>
    %c0_10 = arith.constant 0 : index
    %c0_11 = arith.constant 0 : index
    %6 = vector.load %arg6[%c0_10, %c0_11] : memref<15x32xf32, #tpu.memory_space<vmem>>, vector<1x32xf32>
    %7 = vector.broadcast %6 : vector<1x32xf32> to vector<16x32xf32>
    %8 = arith.addf %5, %7 : vector<16x32xf32>
    %c0_12 = arith.constant 0 : index
    %c1 = arith.constant 1 : index
    %c0_13 = arith.constant 0 : index
    %c0_14 = arith.constant 0 : index
    %9 = vector.load %arg5[%c0_12, %c1, %c0_13, %c0_14] : memref<2x4x32x32xf32, #tpu.memory_space<vmem>>, vector<1x1x32x32xf32>
    %10 = vector.shape_cast %9 : vector<1x1x32x32xf32> to vector<32x32xf32>
    %cst_15 = arith.constant dense<0.000000e+00> : vector<16x32xf32>
    %11 = tpu.matmul %0, %10, %cst_15 {dimension_numbers = #tpu.dot_dimension_numbers<[1], [0], [0], [1], [0, 0, 1, 1], [], []>} : vector<16x32xf32>, vector<32x32xf32>, vector<16x32xf32> -> vector<16x32xf32>
    %c1_16 = arith.constant 1 : index
    %c0_17 = arith.constant 0 : index
    %12 = vector.load %arg6[%c1_16, %c0_17] : memref<15x32xf32, #tpu.memory_space<vmem>>, vector<1x32xf32>
    %13 = vector.broadcast %12 : vector<1x32xf32> to vector<16x32xf32>
    %14 = arith.addf %11, %13 : vector<16x32xf32>
    %c0_18 = arith.constant 0 : index
    %c2 = arith.constant 2 : index
    %c0_19 = arith.constant 0 : index
    %c0_20 = arith.constant 0 : index
    %15 = vector.load %arg5[%c0_18, %c2, %c0_19, %c0_20] : memref<2x4x32x32xf32, #tpu.memory_space<vmem>>, vector<1x1x32x32xf32>
    %16 = vector.shape_cast %15 : vector<1x1x32x32xf32> to vector<32x32xf32>
    %cst_21 = arith.constant dense<0.000000e+00> : vector<16x32xf32>
    %17 = tpu.matmul %0, %16, %cst_21 {dimension_numbers = #tpu.dot_dimension_numbers<[1], [0], [0], [1], [0, 0, 1, 1], [], []>} : vector<16x32xf32>, vector<32x32xf32>, vector<16x32xf32> -> vector<16x32xf32>
    %c2_22 = arith.constant 2 : index
    %c0_23 = arith.constant 0 : index
    %18 = vector.load %arg6[%c2_22, %c0_23] : memref<15x32xf32, #tpu.memory_space<vmem>>, vector<1x32xf32>
    %19 = vector.broadcast %18 : vector<1x32xf32> to vector<16x32xf32>
    %20 = arith.addf %17, %19 : vector<16x32xf32>
    %21 = vector.extract_strided_slice %8 {offsets = [0, 0], sizes = [16, 8], strides = [1, 1]} : vector<16x32xf32> to vector<16x8xf32>
    %22 = vector.shape_cast %21 : vector<16x8xf32> to vector<2x8x8xf32>
    %23 = vector.extract_strided_slice %8 {offsets = [0, 8], sizes = [16, 8], strides = [1, 1]} : vector<16x32xf32> to vector<16x8xf32>
    %24 = vector.shape_cast %23 : vector<16x8xf32> to vector<2x8x8xf32>
    %25 = vector.extract_strided_slice %8 {offsets = [0, 16], sizes = [16, 8], strides = [1, 1]} : vector<16x32xf32> to vector<16x8xf32>
    %26 = vector.shape_cast %25 : vector<16x8xf32> to vector<2x8x8xf32>
    %27 = vector.extract_strided_slice %8 {offsets = [0, 24], sizes = [16, 8], strides = [1, 1]} : vector<16x32xf32> to vector<16x8xf32>
    %28 = vector.shape_cast %27 : vector<16x8xf32> to vector<2x8x8xf32>
    %29 = vector.shape_cast %22 : vector<2x8x8xf32> to vector<2x1x8x8xf32>
    %30 = vector.shape_cast %24 : vector<2x8x8xf32> to vector<2x1x8x8xf32>
    %31 = vector.shape_cast %26 : vector<2x8x8xf32> to vector<2x1x8x8xf32>
    %32 = vector.shape_cast %28 : vector<2x8x8xf32> to vector<2x1x8x8xf32>
    %33 = tpu.concatenate %29, %30, %31, %32 in 1 : vector<2x1x8x8xf32>, vector<2x1x8x8xf32>, vector<2x1x8x8xf32>, vector<2x1x8x8xf32> -> vector<2x4x8x8xf32>
    %34 = vector.shape_cast %33 : vector<2x4x8x8xf32> to vector<8x8x8xf32>
    %35 = vector.extract_strided_slice %14 {offsets = [0, 0], sizes = [16, 8], strides = [1, 1]} : vector<16x32xf32> to vector<16x8xf32>
    %36 = vector.shape_cast %35 : vector<16x8xf32> to vector<2x8x8xf32>
    %37 = vector.extract_strided_slice %14 {offsets = [0, 8], sizes = [16, 8], strides = [1, 1]} : vector<16x32xf32> to vector<16x8xf32>
    %38 = vector.shape_cast %37 : vector<16x8xf32> to vector<2x8x8xf32>
    %39 = vector.extract_strided_slice %14 {offsets = [0, 16], sizes = [16, 8], strides = [1, 1]} : vector<16x32xf32> to vector<16x8xf32>
    %40 = vector.shape_cast %39 : vector<16x8xf32> to vector<2x8x8xf32>
    %41 = vector.extract_strided_slice %14 {offsets = [0, 24], sizes = [16, 8], strides = [1, 1]} : vector<16x32xf32> to vector<16x8xf32>
    %42 = vector.shape_cast %41 : vector<16x8xf32> to vector<2x8x8xf32>
    %43 = vector.shape_cast %36 : vector<2x8x8xf32> to vector<2x1x8x8xf32>
    %44 = vector.shape_cast %38 : vector<2x8x8xf32> to vector<2x1x8x8xf32>
    %45 = vector.shape_cast %40 : vector<2x8x8xf32> to vector<2x1x8x8xf32>
    %46 = vector.shape_cast %42 : vector<2x8x8xf32> to vector<2x1x8x8xf32>
    %47 = tpu.concatenate %43, %44, %45, %46 in 1 : vector<2x1x8x8xf32>, vector<2x1x8x8xf32>, vector<2x1x8x8xf32>, vector<2x1x8x8xf32> -> vector<2x4x8x8xf32>
    %48 = vector.shape_cast %47 : vector<2x4x8x8xf32> to vector<8x8x8xf32>
    %49 = vector.extract_strided_slice %20 {offsets = [0, 0], sizes = [16, 8], strides = [1, 1]} : vector<16x32xf32> to vector<16x8xf32>
    %50 = vector.shape_cast %49 : vector<16x8xf32> to vector<2x8x8xf32>
    %51 = vector.extract_strided_slice %20 {offsets = [0, 8], sizes = [16, 8], strides = [1, 1]} : vector<16x32xf32> to vector<16x8xf32>
    %52 = vector.shape_cast %51 : vector<16x8xf32> to vector<2x8x8xf32>
    %53 = vector.extract_strided_slice %20 {offsets = [0, 16], sizes = [16, 8], strides = [1, 1]} : vector<16x32xf32> to vector<16x8xf32>
    %54 = vector.shape_cast %53 : vector<16x8xf32> to vector<2x8x8xf32>
    %55 = vector.extract_strided_slice %20 {offsets = [0, 24], sizes = [16, 8], strides = [1, 1]} : vector<16x32xf32> to vector<16x8xf32>
    %56 = vector.shape_cast %55 : vector<16x8xf32> to vector<2x8x8xf32>
    %57 = vector.shape_cast %50 : vector<2x8x8xf32> to vector<2x1x8x8xf32>
    %58 = vector.shape_cast %52 : vector<2x8x8xf32> to vector<2x1x8x8xf32>
    %59 = vector.shape_cast %54 : vector<2x8x8xf32> to vector<2x1x8x8xf32>
    %60 = vector.shape_cast %56 : vector<2x8x8xf32> to vector<2x1x8x8xf32>
    %61 = tpu.concatenate %57, %58, %59, %60 in 1 : vector<2x1x8x8xf32>, vector<2x1x8x8xf32>, vector<2x1x8x8xf32>, vector<2x1x8x8xf32> -> vector<2x4x8x8xf32>
    %62 = vector.shape_cast %61 : vector<2x4x8x8xf32> to vector<8x8x8xf32>
    "tpu.trace_start"() <{level = 10 : i32, message = "gqe,gke->gqk"}> : () -> ()
    %cst_24 = arith.constant dense<0.000000e+00> : vector<8x8x8xf32>
    %63 = tpu.matmul %34, %48, %cst_24 {dimension_numbers = #tpu.dot_dimension_numbers<[2], [2], [1], [1], [0, 0, 0, 1, 1, 1], [0], [0]>} : vector<8x8x8xf32>, vector<8x8x8xf32>, vector<8x8x8xf32> -> vector<8x8x8xf32>
    "tpu.trace_stop"() : () -> ()
    %64 = arith.addf %63, %2 : vector<8x8x8xf32>
    %cst_25 = arith.constant dense<0xFF800000> : vector<8x8xf32>
    %65 = vector.multi_reduction <maximumf>, %64, %cst_25 [2] : vector<8x8x8xf32> to vector<8x8xf32>
    %66 = vector.shape_cast %65 : vector<8x8xf32> to vector<8x8x1xf32>
    %67 = vector.broadcast %66 : vector<8x8x1xf32> to vector<8x8x8xf32>
    %68 = arith.subf %64, %67 : vector<8x8x8xf32>
    %69 = math.exp %68 : vector<8x8x8xf32>
    %cst_26 = arith.constant dense<0.000000e+00> : vector<8x8xf32>
    %70 = vector.multi_reduction <add>, %69, %cst_26 [2] : vector<8x8x8xf32> to vector<8x8xf32>
    %71 = vector.shape_cast %70 : vector<8x8xf32> to vector<8x8x1xf32>
    %72 = tpu.reciprocal %71 : vector<8x8x1xf32> -> vector<8x8x1xf32>
    %73 = vector.broadcast %72 : vector<8x8x1xf32> to vector<8x8x8xf32>
    %74 = arith.mulf %69, %73 : vector<8x8x8xf32>
    "tpu.trace_start"() <{level = 10 : i32, message = "gqk,gke->gqe"}> : () -> ()
    %cst_27 = arith.constant dense<0.000000e+00> : vector<8x8x8xf32>
    %75 = tpu.matmul %74, %62, %cst_27 {dimension_numbers = #tpu.dot_dimension_numbers<[2], [1], [1], [2], [0, 0, 0, 1, 1, 2], [0], [0]>} : vector<8x8x8xf32>, vector<8x8x8xf32>, vector<8x8x8xf32> -> vector<8x8x8xf32>
    "tpu.trace_stop"() : () -> ()
    %76 = vector.shape_cast %75 : vector<8x8x8xf32> to vector<2x4x8x8xf32>
    %77 = vector.extract_strided_slice %76 {offsets = [0, 0, 0, 0], sizes = [2, 1, 8, 8], strides = [1, 1, 1, 1]} : vector<2x4x8x8xf32> to vector<2x1x8x8xf32>
    %78 = vector.shape_cast %77 : vector<2x1x8x8xf32> to vector<2x8x8xf32>
    %79 = vector.shape_cast %78 : vector<2x8x8xf32> to vector<16x8xf32>
    %80 = vector.extract_strided_slice %76 {offsets = [0, 1, 0, 0], sizes = [2, 1, 8, 8], strides = [1, 1, 1, 1]} : vector<2x4x8x8xf32> to vector<2x1x8x8xf32>
    %81 = vector.shape_cast %80 : vector<2x1x8x8xf32> to vector<2x8x8xf32>
    %82 = vector.shape_cast %81 : vector<2x8x8xf32> to vector<16x8xf32>
    %83 = vector.extract_strided_slice %76 {offsets = [0, 2, 0, 0], sizes = [2, 1, 8, 8], strides = [1, 1, 1, 1]} : vector<2x4x8x8xf32> to vector<2x1x8x8xf32>
    %84 = vector.shape_cast %83 : vector<2x1x8x8xf32> to vector<2x8x8xf32>
    %85 = vector.shape_cast %84 : vector<2x8x8xf32> to vector<16x8xf32>
    %86 = vector.extract_strided_slice %76 {offsets = [0, 3, 0, 0], sizes = [2, 1, 8, 8], strides = [1, 1, 1, 1]} : vector<2x4x8x8xf32> to vector<2x1x8x8xf32>
    %87 = vector.shape_cast %86 : vector<2x1x8x8xf32> to vector<2x8x8xf32>
    %88 = vector.shape_cast %87 : vector<2x8x8xf32> to vector<16x8xf32>
    %89 = tpu.concatenate %79, %82, %85, %88 in 1 : vector<16x8xf32>, vector<16x8xf32>, vector<16x8xf32>, vector<16x8xf32> -> vector<16x32xf32>
    %c0_28 = arith.constant 0 : index
    %c3 = arith.constant 3 : index
    %c0_29 = arith.constant 0 : index
    %c0_30 = arith.constant 0 : index
    %90 = vector.load %arg5[%c0_28, %c3, %c0_29, %c0_30] : memref<2x4x32x32xf32, #tpu.memory_space<vmem>>, vector<1x1x32x32xf32>
    %91 = vector.shape_cast %90 : vector<1x1x32x32xf32> to vector<32x32xf32>
    %cst_31 = arith.constant dense<0.000000e+00> : vector<16x32xf32>
    %92 = tpu.matmul %89, %91, %cst_31 {dimension_numbers = #tpu.dot_dimension_numbers<[1], [0], [0], [1], [0, 0, 1, 1], [], []>} : vector<16x32xf32>, vector<32x32xf32>, vector<16x32xf32> -> vector<16x32xf32>
    %c3_32 = arith.constant 3 : index
    %c0_33 = arith.constant 0 : index
    %93 = vector.load %arg6[%c3_32, %c0_33] : memref<15x32xf32, #tpu.memory_space<vmem>>, vector<1x32xf32>
    %94 = vector.broadcast %93 : vector<1x32xf32> to vector<16x32xf32>
    %95 = arith.addf %92, %94 : vector<16x32xf32>
    %96 = arith.addf %0, %95 : vector<16x32xf32>
    %cst_34 = arith.constant dense<0.000000e+00> : vector<16xf32>
    %97 = vector.multi_reduction <add>, %96, %cst_34 [1] : vector<16x32xf32> to vector<16xf32>
    %98 = vector.shape_cast %97 : vector<16xf32> to vector<16x1xf32>
    %cst_35 = arith.constant 3.200000e+01 : f32
    %99 = vector.broadcast %cst_35 : f32 to vector<16x1xf32>
    %100 = arith.divf %98, %99 : vector<16x1xf32>
    %101 = vector.broadcast %100 : vector<16x1xf32> to vector<16x32xf32>
    %102 = arith.subf %96, %101 : vector<16x32xf32>
    %103 = arith.mulf %102, %102 : vector<16x32xf32>
    %cst_36 = arith.constant dense<0.000000e+00> : vector<16xf32>
    %104 = vector.multi_reduction <add>, %103, %cst_36 [1] : vector<16x32xf32> to vector<16xf32>
    %105 = vector.shape_cast %104 : vector<16xf32> to vector<16x1xf32>
    %cst_37 = arith.constant 0.0322580636 : f32
    %106 = vector.broadcast %cst_37 : f32 to vector<16x1xf32>
    %107 = arith.mulf %105, %106 : vector<16x1xf32>
    %c8 = arith.constant 8 : index
    %c0_38 = arith.constant 0 : index
    %108 = vector.load %arg6[%c8, %c0_38] : memref<15x32xf32, #tpu.memory_space<vmem>>, vector<1x32xf32>
    %cst_39 = arith.constant 9.99999996E-13 : f32
    %109 = vector.broadcast %cst_39 : f32 to vector<16x1xf32>
    %110 = arith.addf %107, %109 : vector<16x1xf32>
    %111 = math.rsqrt %110 : vector<16x1xf32>
    %112 = vector.broadcast %111 : vector<16x1xf32> to vector<16x32xf32>
    %113 = arith.mulf %102, %112 : vector<16x32xf32>
    %114 = vector.broadcast %108 : vector<1x32xf32> to vector<16x32xf32>
    %115 = arith.mulf %114, %113 : vector<16x32xf32>
    %c9 = arith.constant 9 : index
    %c0_40 = arith.constant 0 : index
    %116 = vector.load %arg6[%c9, %c0_40] : memref<15x32xf32, #tpu.memory_space<vmem>>, vector<1x32xf32>
    %117 = vector.broadcast %116 : vector<1x32xf32> to vector<16x32xf32>
    %118 = arith.addf %115, %117 : vector<16x32xf32>
    %c0_41 = arith.constant 0 : index
    %c0_42 = arith.constant 0 : index
    %c0_43 = arith.constant 0 : index
    %119 = vector.load %arg4[%c0_41, %c0_42, %c0_43] : memref<8x8x8xf32, #tpu.memory_space<vmem>>, vector<8x8x8xf32>
    %c1_44 = arith.constant 1 : index
    %c0_45 = arith.constant 0 : index
    %c0_46 = arith.constant 0 : index
    %c0_47 = arith.constant 0 : index
    %120 = vector.load %arg5[%c1_44, %c0_45, %c0_46, %c0_47] : memref<2x4x32x32xf32, #tpu.memory_space<vmem>>, vector<1x1x32x32xf32>
    %121 = vector.shape_cast %120 : vector<1x1x32x32xf32> to vector<32x32xf32>
    %cst_48 = arith.constant dense<0.000000e+00> : vector<16x32xf32>
    %122 = tpu.matmul %118, %121, %cst_48 {dimension_numbers = #tpu.dot_dimension_numbers<[1], [0], [0], [1], [0, 0, 1, 1], [], []>} : vector<16x32xf32>, vector<32x32xf32>, vector<16x32xf32> -> vector<16x32xf32>
    %c4 = arith.constant 4 : index
    %c0_49 = arith.constant 0 : index
    %123 = vector.load %arg6[%c4, %c0_49] : memref<15x32xf32, #tpu.memory_space<vmem>>, vector<1x32xf32>
    %124 = vector.broadcast %123 : vector<1x32xf32> to vector<16x32xf32>
    %125 = arith.addf %122, %124 : vector<16x32xf32>
    %c1_50 = arith.constant 1 : index
    %c1_51 = arith.constant 1 : index
    %c0_52 = arith.constant 0 : index
    %c0_53 = arith.constant 0 : index
    %126 = vector.load %arg5[%c1_50, %c1_51, %c0_52, %c0_53] : memref<2x4x32x32xf32, #tpu.memory_space<vmem>>, vector<1x1x32x32xf32>
    %127 = vector.shape_cast %126 : vector<1x1x32x32xf32> to vector<32x32xf32>
    %cst_54 = arith.constant dense<0.000000e+00> : vector<16x32xf32>
    %128 = tpu.matmul %1, %127, %cst_54 {dimension_numbers = #tpu.dot_dimension_numbers<[1], [0], [0], [1], [0, 0, 1, 1], [], []>} : vector<16x32xf32>, vector<32x32xf32>, vector<16x32xf32> -> vector<16x32xf32>
    %c5 = arith.constant 5 : index
    %c0_55 = arith.constant 0 : index
    %129 = vector.load %arg6[%c5, %c0_55] : memref<15x32xf32, #tpu.memory_space<vmem>>, vector<1x32xf32>
    %130 = vector.broadcast %129 : vector<1x32xf32> to vector<16x32xf32>
    %131 = arith.addf %128, %130 : vector<16x32xf32>
    %c1_56 = arith.constant 1 : index
    %c2_57 = arith.constant 2 : index
    %c0_58 = arith.constant 0 : index
    %c0_59 = arith.constant 0 : index
    %132 = vector.load %arg5[%c1_56, %c2_57, %c0_58, %c0_59] : memref<2x4x32x32xf32, #tpu.memory_space<vmem>>, vector<1x1x32x32xf32>
    %133 = vector.shape_cast %132 : vector<1x1x32x32xf32> to vector<32x32xf32>
    %cst_60 = arith.constant dense<0.000000e+00> : vector<16x32xf32>
    %134 = tpu.matmul %1, %133, %cst_60 {dimension_numbers = #tpu.dot_dimension_numbers<[1], [0], [0], [1], [0, 0, 1, 1], [], []>} : vector<16x32xf32>, vector<32x32xf32>, vector<16x32xf32> -> vector<16x32xf32>
    %c6 = arith.constant 6 : index
    %c0_61 = arith.constant 0 : index
    %135 = vector.load %arg6[%c6, %c0_61] : memref<15x32xf32, #tpu.memory_space<vmem>>, vector<1x32xf32>
    %136 = vector.broadcast %135 : vector<1x32xf32> to vector<16x32xf32>
    %137 = arith.addf %134, %136 : vector<16x32xf32>
    %138 = vector.extract_strided_slice %125 {offsets = [0, 0], sizes = [16, 8], strides = [1, 1]} : vector<16x32xf32> to vector<16x8xf32>
    %139 = vector.shape_cast %138 : vector<16x8xf32> to vector<2x8x8xf32>
    %140 = vector.extract_strided_slice %125 {offsets = [0, 8], sizes = [16, 8], strides = [1, 1]} : vector<16x32xf32> to vector<16x8xf32>
    %141 = vector.shape_cast %140 : vector<16x8xf32> to vector<2x8x8xf32>
    %142 = vector.extract_strided_slice %125 {offsets = [0, 16], sizes = [16, 8], strides = [1, 1]} : vector<16x32xf32> to vector<16x8xf32>
    %143 = vector.shape_cast %142 : vector<16x8xf32> to vector<2x8x8xf32>
    %144 = vector.extract_strided_slice %125 {offsets = [0, 24], sizes = [16, 8], strides = [1, 1]} : vector<16x32xf32> to vector<16x8xf32>
    %145 = vector.shape_cast %144 : vector<16x8xf32> to vector<2x8x8xf32>
    %146 = vector.shape_cast %139 : vector<2x8x8xf32> to vector<2x1x8x8xf32>
    %147 = vector.shape_cast %141 : vector<2x8x8xf32> to vector<2x1x8x8xf32>
    %148 = vector.shape_cast %143 : vector<2x8x8xf32> to vector<2x1x8x8xf32>
    %149 = vector.shape_cast %145 : vector<2x8x8xf32> to vector<2x1x8x8xf32>
    %150 = tpu.concatenate %146, %147, %148, %149 in 1 : vector<2x1x8x8xf32>, vector<2x1x8x8xf32>, vector<2x1x8x8xf32>, vector<2x1x8x8xf32> -> vector<2x4x8x8xf32>
    %151 = vector.shape_cast %150 : vector<2x4x8x8xf32> to vector<8x8x8xf32>
    %152 = vector.extract_strided_slice %131 {offsets = [0, 0], sizes = [16, 8], strides = [1, 1]} : vector<16x32xf32> to vector<16x8xf32>
    %153 = vector.shape_cast %152 : vector<16x8xf32> to vector<2x8x8xf32>
    %154 = vector.extract_strided_slice %131 {offsets = [0, 8], sizes = [16, 8], strides = [1, 1]} : vector<16x32xf32> to vector<16x8xf32>
    %155 = vector.shape_cast %154 : vector<16x8xf32> to vector<2x8x8xf32>
    %156 = vector.extract_strided_slice %131 {offsets = [0, 16], sizes = [16, 8], strides = [1, 1]} : vector<16x32xf32> to vector<16x8xf32>
    %157 = vector.shape_cast %156 : vector<16x8xf32> to vector<2x8x8xf32>
    %158 = vector.extract_strided_slice %131 {offsets = [0, 24], sizes = [16, 8], strides = [1, 1]} : vector<16x32xf32> to vector<16x8xf32>
    %159 = vector.shape_cast %158 : vector<16x8xf32> to vector<2x8x8xf32>
    %160 = vector.shape_cast %153 : vector<2x8x8xf32> to vector<2x1x8x8xf32>
    %161 = vector.shape_cast %155 : vector<2x8x8xf32> to vector<2x1x8x8xf32>
    %162 = vector.shape_cast %157 : vector<2x8x8xf32> to vector<2x1x8x8xf32>
    %163 = vector.shape_cast %159 : vector<2x8x8xf32> to vector<2x1x8x8xf32>
    %164 = tpu.concatenate %160, %161, %162, %163 in 1 : vector<2x1x8x8xf32>, vector<2x1x8x8xf32>, vector<2x1x8x8xf32>, vector<2x1x8x8xf32> -> vector<2x4x8x8xf32>
    %165 = vector.shape_cast %164 : vector<2x4x8x8xf32> to vector<8x8x8xf32>
    %166 = vector.extract_strided_slice %137 {offsets = [0, 0], sizes = [16, 8], strides = [1, 1]} : vector<16x32xf32> to vector<16x8xf32>
    %167 = vector.shape_cast %166 : vector<16x8xf32> to vector<2x8x8xf32>
    %168 = vector.extract_strided_slice %137 {offsets = [0, 8], sizes = [16, 8], strides = [1, 1]} : vector<16x32xf32> to vector<16x8xf32>
    %169 = vector.shape_cast %168 : vector<16x8xf32> to vector<2x8x8xf32>
    %170 = vector.extract_strided_slice %137 {offsets = [0, 16], sizes = [16, 8], strides = [1, 1]} : vector<16x32xf32> to vector<16x8xf32>
    %171 = vector.shape_cast %170 : vector<16x8xf32> to vector<2x8x8xf32>
    %172 = vector.extract_strided_slice %137 {offsets = [0, 24], sizes = [16, 8], strides = [1, 1]} : vector<16x32xf32> to vector<16x8xf32>
    %173 = vector.shape_cast %172 : vector<16x8xf32> to vector<2x8x8xf32>
    %174 = vector.shape_cast %167 : vector<2x8x8xf32> to vector<2x1x8x8xf32>
    %175 = vector.shape_cast %169 : vector<2x8x8xf32> to vector<2x1x8x8xf32>
    %176 = vector.shape_cast %171 : vector<2x8x8xf32> to vector<2x1x8x8xf32>
    %177 = vector.shape_cast %173 : vector<2x8x8xf32> to vector<2x1x8x8xf32>
    %178 = tpu.concatenate %174, %175, %176, %177 in 1 : vector<2x1x8x8xf32>, vector<2x1x8x8xf32>, vector<2x1x8x8xf32>, vector<2x1x8x8xf32> -> vector<2x4x8x8xf32>
    %179 = vector.shape_cast %178 : vector<2x4x8x8xf32> to vector<8x8x8xf32>
    "tpu.trace_start"() <{level = 10 : i32, message = "gqe,gke->gqk"}> : () -> ()
    %cst_62 = arith.constant dense<0.000000e+00> : vector<8x8x8xf32>
    %180 = tpu.matmul %151, %165, %cst_62 {dimension_numbers = #tpu.dot_dimension_numbers<[2], [2], [1], [1], [0, 0, 0, 1, 1, 1], [0], [0]>} : vector<8x8x8xf32>, vector<8x8x8xf32>, vector<8x8x8xf32> -> vector<8x8x8xf32>
    "tpu.trace_stop"() : () -> ()
    %181 = arith.addf %180, %119 : vector<8x8x8xf32>
    %cst_63 = arith.constant dense<0xFF800000> : vector<8x8xf32>
    %182 = vector.multi_reduction <maximumf>, %181, %cst_63 [2] : vector<8x8x8xf32> to vector<8x8xf32>
    %183 = vector.shape_cast %182 : vector<8x8xf32> to vector<8x8x1xf32>
    %184 = vector.broadcast %183 : vector<8x8x1xf32> to vector<8x8x8xf32>
    %185 = arith.subf %181, %184 : vector<8x8x8xf32>
    %186 = math.exp %185 : vector<8x8x8xf32>
    %cst_64 = arith.constant dense<0.000000e+00> : vector<8x8xf32>
    %187 = vector.multi_reduction <add>, %186, %cst_64 [2] : vector<8x8x8xf32> to vector<8x8xf32>
    %188 = vector.shape_cast %187 : vector<8x8xf32> to vector<8x8x1xf32>
    %189 = tpu.reciprocal %188 : vector<8x8x1xf32> -> vector<8x8x1xf32>
    %190 = vector.broadcast %189 : vector<8x8x1xf32> to vector<8x8x8xf32>
    %191 = arith.mulf %186, %190 : vector<8x8x8xf32>
    "tpu.trace_start"() <{level = 10 : i32, message = "gqk,gke->gqe"}> : () -> ()
    %cst_65 = arith.constant dense<0.000000e+00> : vector<8x8x8xf32>
    %192 = tpu.matmul %191, %179, %cst_65 {dimension_numbers = #tpu.dot_dimension_numbers<[2], [1], [1], [2], [0, 0, 0, 1, 1, 2], [0], [0]>} : vector<8x8x8xf32>, vector<8x8x8xf32>, vector<8x8x8xf32> -> vector<8x8x8xf32>
    "tpu.trace_stop"() : () -> ()
    %193 = vector.shape_cast %192 : vector<8x8x8xf32> to vector<2x4x8x8xf32>
    %194 = vector.extract_strided_slice %193 {offsets = [0, 0, 0, 0], sizes = [2, 1, 8, 8], strides = [1, 1, 1, 1]} : vector<2x4x8x8xf32> to vector<2x1x8x8xf32>
    %195 = vector.shape_cast %194 : vector<2x1x8x8xf32> to vector<2x8x8xf32>
    %196 = vector.shape_cast %195 : vector<2x8x8xf32> to vector<16x8xf32>
    %197 = vector.extract_strided_slice %193 {offsets = [0, 1, 0, 0], sizes = [2, 1, 8, 8], strides = [1, 1, 1, 1]} : vector<2x4x8x8xf32> to vector<2x1x8x8xf32>
    %198 = vector.shape_cast %197 : vector<2x1x8x8xf32> to vector<2x8x8xf32>
    %199 = vector.shape_cast %198 : vector<2x8x8xf32> to vector<16x8xf32>
    %200 = vector.extract_strided_slice %193 {offsets = [0, 2, 0, 0], sizes = [2, 1, 8, 8], strides = [1, 1, 1, 1]} : vector<2x4x8x8xf32> to vector<2x1x8x8xf32>
    %201 = vector.shape_cast %200 : vector<2x1x8x8xf32> to vector<2x8x8xf32>
    %202 = vector.shape_cast %201 : vector<2x8x8xf32> to vector<16x8xf32>
    %203 = vector.extract_strided_slice %193 {offsets = [0, 3, 0, 0], sizes = [2, 1, 8, 8], strides = [1, 1, 1, 1]} : vector<2x4x8x8xf32> to vector<2x1x8x8xf32>
    %204 = vector.shape_cast %203 : vector<2x1x8x8xf32> to vector<2x8x8xf32>
    %205 = vector.shape_cast %204 : vector<2x8x8xf32> to vector<16x8xf32>
    %206 = tpu.concatenate %196, %199, %202, %205 in 1 : vector<16x8xf32>, vector<16x8xf32>, vector<16x8xf32>, vector<16x8xf32> -> vector<16x32xf32>
    %c1_66 = arith.constant 1 : index
    %c3_67 = arith.constant 3 : index
    %c0_68 = arith.constant 0 : index
    %c0_69 = arith.constant 0 : index
    %207 = vector.load %arg5[%c1_66, %c3_67, %c0_68, %c0_69] : memref<2x4x32x32xf32, #tpu.memory_space<vmem>>, vector<1x1x32x32xf32>
    %208 = vector.shape_cast %207 : vector<1x1x32x32xf32> to vector<32x32xf32>
    %cst_70 = arith.constant dense<0.000000e+00> : vector<16x32xf32>
    %209 = tpu.matmul %206, %208, %cst_70 {dimension_numbers = #tpu.dot_dimension_numbers<[1], [0], [0], [1], [0, 0, 1, 1], [], []>} : vector<16x32xf32>, vector<32x32xf32>, vector<16x32xf32> -> vector<16x32xf32>
    %c7 = arith.constant 7 : index
    %c0_71 = arith.constant 0 : index
    %210 = vector.load %arg6[%c7, %c0_71] : memref<15x32xf32, #tpu.memory_space<vmem>>, vector<1x32xf32>
    %211 = vector.broadcast %210 : vector<1x32xf32> to vector<16x32xf32>
    %212 = arith.addf %209, %211 : vector<16x32xf32>
    %213 = arith.addf %118, %212 : vector<16x32xf32>
    %cst_72 = arith.constant dense<0.000000e+00> : vector<16xf32>
    %214 = vector.multi_reduction <add>, %213, %cst_72 [1] : vector<16x32xf32> to vector<16xf32>
    %215 = vector.shape_cast %214 : vector<16xf32> to vector<16x1xf32>
    %cst_73 = arith.constant 3.200000e+01 : f32
    %216 = vector.broadcast %cst_73 : f32 to vector<16x1xf32>
    %217 = arith.divf %215, %216 : vector<16x1xf32>
    %218 = vector.broadcast %217 : vector<16x1xf32> to vector<16x32xf32>
    %219 = arith.subf %213, %218 : vector<16x32xf32>
    %220 = arith.mulf %219, %219 : vector<16x32xf32>
    %cst_74 = arith.constant dense<0.000000e+00> : vector<16xf32>
    %221 = vector.multi_reduction <add>, %220, %cst_74 [1] : vector<16x32xf32> to vector<16xf32>
    %222 = vector.shape_cast %221 : vector<16xf32> to vector<16x1xf32>
    %cst_75 = arith.constant 0.0322580636 : f32
    %223 = vector.broadcast %cst_75 : f32 to vector<16x1xf32>
    %224 = arith.mulf %222, %223 : vector<16x1xf32>
    %c10 = arith.constant 10 : index
    %c0_76 = arith.constant 0 : index
    %225 = vector.load %arg6[%c10, %c0_76] : memref<15x32xf32, #tpu.memory_space<vmem>>, vector<1x32xf32>
    %cst_77 = arith.constant 9.99999996E-13 : f32
    %226 = vector.broadcast %cst_77 : f32 to vector<16x1xf32>
    %227 = arith.addf %224, %226 : vector<16x1xf32>
    %228 = math.rsqrt %227 : vector<16x1xf32>
    %229 = vector.broadcast %228 : vector<16x1xf32> to vector<16x32xf32>
    %230 = arith.mulf %219, %229 : vector<16x32xf32>
    %231 = vector.broadcast %225 : vector<1x32xf32> to vector<16x32xf32>
    %232 = arith.mulf %231, %230 : vector<16x32xf32>
    %c11 = arith.constant 11 : index
    %c0_78 = arith.constant 0 : index
    %233 = vector.load %arg6[%c11, %c0_78] : memref<15x32xf32, #tpu.memory_space<vmem>>, vector<1x32xf32>
    %234 = vector.broadcast %233 : vector<1x32xf32> to vector<16x32xf32>
    %235 = arith.addf %232, %234 : vector<16x32xf32>
    %c0_79 = arith.constant 0 : index
    %c0_80 = arith.constant 0 : index
    %236 = vector.load %arg7[%c0_79, %c0_80] : memref<32x64xf32, #tpu.memory_space<vmem>>, vector<32x64xf32>
    %cst_81 = arith.constant dense<0.000000e+00> : vector<16x64xf32>
    %237 = tpu.matmul %235, %236, %cst_81 {dimension_numbers = #tpu.dot_dimension_numbers<[1], [0], [0], [1], [0, 0, 1, 1], [], []>} : vector<16x32xf32>, vector<32x64xf32>, vector<16x64xf32> -> vector<16x64xf32>
    %c0_82 = arith.constant 0 : index
    %c0_83 = arith.constant 0 : index
    %238 = vector.load %arg8[%c0_82, %c0_83] : memref<1x64xf32, #tpu.memory_space<vmem>>, vector<1x64xf32>
    %239 = vector.broadcast %238 : vector<1x64xf32> to vector<16x64xf32>
    %240 = arith.addf %237, %239 : vector<16x64xf32>
    %cst_84 = arith.constant 0.000000e+00 : f32
    %241 = vector.broadcast %cst_84 : f32 to vector<16x64xf32>
    %242 = arith.maximumf %240, %241 : vector<16x64xf32>
    %c0_85 = arith.constant 0 : index
    %c0_86 = arith.constant 0 : index
    %243 = vector.load %arg9[%c0_85, %c0_86] : memref<64x32xf32, #tpu.memory_space<vmem>>, vector<64x32xf32>
    %cst_87 = arith.constant dense<0.000000e+00> : vector<16x32xf32>
    %244 = tpu.matmul %242, %243, %cst_87 {dimension_numbers = #tpu.dot_dimension_numbers<[1], [0], [0], [1], [0, 0, 1, 1], [], []>} : vector<16x64xf32>, vector<64x32xf32>, vector<16x32xf32> -> vector<16x32xf32>
    %c14 = arith.constant 14 : index
    %c0_88 = arith.constant 0 : index
    %245 = vector.load %arg6[%c14, %c0_88] : memref<15x32xf32, #tpu.memory_space<vmem>>, vector<1x32xf32>
    %246 = vector.broadcast %245 : vector<1x32xf32> to vector<16x32xf32>
    %247 = arith.addf %244, %246 : vector<16x32xf32>
    %248 = arith.addf %235, %247 : vector<16x32xf32>
    %cst_89 = arith.constant dense<0.000000e+00> : vector<16xf32>
    %249 = vector.multi_reduction <add>, %248, %cst_89 [1] : vector<16x32xf32> to vector<16xf32>
    %250 = vector.shape_cast %249 : vector<16xf32> to vector<16x1xf32>
    %cst_90 = arith.constant 3.200000e+01 : f32
    %251 = vector.broadcast %cst_90 : f32 to vector<16x1xf32>
    %252 = arith.divf %250, %251 : vector<16x1xf32>
    %253 = vector.broadcast %252 : vector<16x1xf32> to vector<16x32xf32>
    %254 = arith.subf %248, %253 : vector<16x32xf32>
    %255 = arith.mulf %254, %254 : vector<16x32xf32>
    %cst_91 = arith.constant dense<0.000000e+00> : vector<16xf32>
    %256 = vector.multi_reduction <add>, %255, %cst_91 [1] : vector<16x32xf32> to vector<16xf32>
    %257 = vector.shape_cast %256 : vector<16xf32> to vector<16x1xf32>
    %cst_92 = arith.constant 0.0322580636 : f32
    %258 = vector.broadcast %cst_92 : f32 to vector<16x1xf32>
    %259 = arith.mulf %257, %258 : vector<16x1xf32>
    %c12 = arith.constant 12 : index
    %c0_93 = arith.constant 0 : index
    %260 = vector.load %arg6[%c12, %c0_93] : memref<15x32xf32, #tpu.memory_space<vmem>>, vector<1x32xf32>
    %cst_94 = arith.constant 9.99999996E-13 : f32
    %261 = vector.broadcast %cst_94 : f32 to vector<16x1xf32>
    %262 = arith.addf %259, %261 : vector<16x1xf32>
    %263 = math.rsqrt %262 : vector<16x1xf32>
    %264 = vector.broadcast %263 : vector<16x1xf32> to vector<16x32xf32>
    %265 = arith.mulf %254, %264 : vector<16x32xf32>
    %266 = vector.broadcast %260 : vector<1x32xf32> to vector<16x32xf32>
    %267 = arith.mulf %266, %265 : vector<16x32xf32>
    %c13 = arith.constant 13 : index
    %c0_95 = arith.constant 0 : index
    %268 = vector.load %arg6[%c13, %c0_95] : memref<15x32xf32, #tpu.memory_space<vmem>>, vector<1x32xf32>
    %269 = vector.broadcast %268 : vector<1x32xf32> to vector<16x32xf32>
    %270 = arith.addf %267, %269 : vector<16x32xf32>
    %c0_96 = arith.constant 0 : index
    %c0_97 = arith.constant 0 : index
    %271 = vector.load %arg10[%c0_96, %c0_97] : memref<16x32xf32, #tpu.memory_space<vmem>>, vector<16x32xf32>
    tpu.vector_store %arg10[%c0_96, %c0_97], %270 {strides = array<i32>} : memref<16x32xf32, #tpu.memory_space<vmem>>, vector<16x32xf32>,
    return
  }
  func.func @transform_0(%arg0: i32) -> (i32, i32) {
    %c0_i32 = arith.constant 0 : i32
    %c0_i32_0 = arith.constant 0 : i32
    %c0_i32_1 = arith.constant 0 : i32
    return %c0_i32, %c0_i32_0 : i32, i32
  }
  func.func @transform_1(%arg0: i32) -> (i32, i32) {
    %c0_i32 = arith.constant 0 : i32
    %c0_i32_0 = arith.constant 0 : i32
    %c0_i32_1 = arith.constant 0 : i32
    return %c0_i32, %c0_i32_0 : i32, i32
  }
  func.func @transform_2(%arg0: i32) -> (i32, i32, i32) {
    %c0_i32 = arith.constant 0 : i32
    %c0_i32_0 = arith.constant 0 : i32
    %c0_i32_1 = arith.constant 0 : i32
    %c0_i32_2 = arith.constant 0 : i32
    return %c0_i32, %c0_i32_0, %c0_i32_1 : i32, i32, i32
  }
  func.func @transform_3(%arg0: i32) -> (i32, i32, i32) {
    %c0_i32 = arith.constant 0 : i32
    %c0_i32_0 = arith.constant 0 : i32
    %c0_i32_1 = arith.constant 0 : i32
    %c0_i32_2 = arith.constant 0 : i32
    return %c0_i32, %c0_i32_0, %c0_i32_1 : i32, i32, i32
  }
  func.func @transform_4(%arg0: i32) -> (i32, i32, i32, i32) {
    %c0_i32 = arith.constant 0 : i32
    %c0_i32_0 = arith.constant 0 : i32
    %c0_i32_1 = arith.constant 0 : i32
    %c0_i32_2 = arith.constant 0 : i32
    %c0_i32_3 = arith.constant 0 : i32
    return %c0_i32, %c0_i32_0, %c0_i32_1, %c0_i32_2 : i32, i32, i32, i32
  }
  func.func @transform_5(%arg0: i32) -> (i32, i32) {
    %c0_i32 = arith.constant 0 : i32
    %c0_i32_0 = arith.constant 0 : i32
    %c0_i32_1 = arith.constant 0 : i32
    return %c0_i32, %c0_i32_0 : i32, i32
  }
  func.func @transform_6(%arg0: i32) -> (i32, i32) {
    %c0_i32 = arith.constant 0 : i32
    %c0_i32_0 = arith.constant 0 : i32
    %c0_i32_1 = arith.constant 0 : i32
    return %c0_i32, %c0_i32_0 : i32, i32
  }
  func.func @transform_7(%arg0: i32) -> (i32, i32) {
    %c0_i32 = arith.constant 0 : i32
    %c0_i32_0 = arith.constant 0 : i32
    %c0_i32_1 = arith.constant 0 : i32
    return %c0_i32, %c0_i32_0 : i32, i32
  }
  func.func @transform_8(%arg0: i32) -> (i32, i32) {
    %c0_i32 = arith.constant 0 : i32
    %c0_i32_0 = arith.constant 0 : i32
    %c0_i32_1 = arith.constant 0 : i32
    return %c0_i32, %c0_i32_0 : i32, i32
  }
  func.func @transform_9(%arg0: i32) -> (i32, i32) {
    %c0_i32 = arith.constant 0 : i32
    %c0_i32_0 = arith.constant 0 : i32
    %c0_i32_1 = arith.constant 0 : i32
    return %c0_i32, %c0_i32_0 : i32, i32
  }
}

</mosaic_0001>

<bundles_post_ra>
// kernel: tpu_custom_call.1
= control target key start
LH: loop header
LB: loop body
LE: loop exit
PB: predicated region body
PF: predicated region fallthrough
CT: control target
= control target key end

     0   :  { %14 = vsyncpa [#allocation3], 0  ;;  %s2831_s0 = inlined_call_operand.hbm [shape: f32[16,32], index: 0, kind: input, shape index: {}]   ;;  %s2832_s1 = inlined_call_operand.hbm [shape: f32[16,32], index: 1, kind: input, shape index: {}]   ;;  %s2833_s2 = inlined_call_operand.vmem [shape: f32[8,8,8], index: 2, kind: input, shape index: {}]   ;;  %s2834_s3 = inlined_call_operand.hbm [shape: f32[8,8,8], index: 3, kind: input, shape index: {}]   ;;  %s2835_s4 = inlined_call_operand.hbm [shape: f32[2,4,32,32], index: 4, kind: input, shape index: {}]   ;;  %s2836_s5 = inlined_call_operand.hbm [shape: f32[15,32], index: 5, kind: input, shape index: {}]   ;;  %s2837_s6 = inlined_call_operand.vmem [shape: f32[32,64], index: 6, kind: input, shape index: {}]   ;;  %s2838_s7 = inlined_call_operand.vmem [shape: f32[1,64], index: 7, kind: input, shape index: {}]   ;;  %s2839_s8 = inlined_call_operand.vmem [shape: f32[64,32], index: 8, kind: input, shape index: {}]   ;;  %s2840_s9 = inlined_call_operand.hbm [shape: f32[16,32], index: 9, kind: output, shape index: {}]  }
   0x1   :  { %15 = vsyncpa [#allocation6], 0 }
   0x2   :  { %16 = vsyncpa [#allocation9], 0 }
   0x3   :  { %17 = vsyncpa [#allocation4], 0  ;;  %s35_s11 = sshll.u32 %s2832_s1, 4  ;;  %s2295_s12 = smov [#allocation5]   ;;  %s36_s11 = int_to_ptr.hbm [resolvable:$true] %s35_s11 }
   0x4   :  { %s37_s13 = sshll.u32 %s2295_s12, 4  ;;  %s63_s16 = sshll.u32 %s2835_s4, 4  ;;  %s38_s13 = int_to_ptr.vmem [resolvable:$true] %s37_s13  ;;  %s64_s16 = int_to_ptr.hbm [resolvable:$true] %s63_s16 }
   0x5   :  { %s2296_s17 = smov 128   ;;  %s2297_s18 = smov 8  }
   0x6   :  { %43 = dma.hbm_to_vmem [thread:$0]  %s36_s11, 256, %s38_s13, [#allocation6], %s2296_s17, %s2296_s17, %s2297_s18  }
   0x7   :  { %s2298_s19 = smov [#allocation8]   ;;  %s22_s1 = sshll.u32 %s2831_s0, 4  ;;  %s23_s1 = int_to_ptr.hbm [resolvable:$true] %s22_s1 }
   0x8   :  { %s65_s20 = sshll.u32 %s2298_s19, 4  ;;  %s50_s24 = sshll.u32 %s2834_s3, 4  ;;  %s66_s20 = int_to_ptr.vmem [resolvable:$true] %s65_s20  ;;  %s51_s24 = int_to_ptr.hbm [resolvable:$true] %s50_s24 }
   0x9   :  { %71 = dma.hbm_to_vmem [thread:$0]  %s64_s16, 4096, %s66_s20, [#allocation9], %s2296_s17, %s2296_s17, %s2297_s18  }
   0xa   :  { %s2299_s25 = smov [#allocation2]   ;;  %s2300_s27 = smov [#allocation7]  }
   0xb   :  { %s24_s26 = sshll.u32 %s2299_s25, 4  ;;  %s52_s0 = sshll.u32 %s2300_s27, 4  ;;  %s25_s26 = int_to_ptr.vmem [resolvable:$true] %s24_s26  ;;  %s53_s0 = int_to_ptr.vmem [resolvable:$true] %s52_s0 }
   0xc   :  { %30 = dma.hbm_to_vmem [thread:$0]  %s23_s1, 256, %s25_s26, [#allocation3], %s2296_s17, %s2296_s17, %s2297_s18  }
   0xd   :  { %s76_s30 = sshll.u32 %s2836_s5, 4  ;;  %s2301_s3 = smov [#allocation10]   ;;  %s77_s30 = int_to_ptr.hbm [resolvable:$true] %s76_s30 }
   0xe   :  { %58 = dma.hbm_to_vmem [thread:$0]  %s51_s24, 1024, %s53_s0, [#allocation6], %s2296_s17, %s2296_s17, %s2297_s18  }
   0xf   :  { %s78_s10 = sshll.u32 %s2301_s3, 4  ;;  %s79_s10 = int_to_ptr.vmem [resolvable:$true] %s78_s10 }
  0x10   :  { %84 = dma.hbm_to_vmem [thread:$0]  %s77_s30, 256, %s79_s10, [#allocation9], %s2296_s17, %s2296_s17, %s2297_s18  }
  0x11   :  { %2287 = dma.done.wait [#allocation3], 256  }
  0x12   :  { %2288 = vsyncadd [#allocation3], 4294967040 }
  0x13   :  { %2289 = dma.done.wait [#allocation6], 1280  }
  0x14   :  { %2290 = vsyncadd [#allocation6], 4294966016 }
  0x15   :  { %2291 = dma.done.wait [#allocation9], 4352  }
  0x16   :  { %2292 = vsyncadd [#allocation9], 4294962944  ;;  %v163_v0 = vld [vmem:[#allocation8 + $0x38] sm:$0xff]  ;;  %v162_v1 = vld [vmem:[#allocation8 + $0x30] sm:$0xff]  ;;  %vm129_vm0 = vcmask 261120   ;;  %vm267_vm1 = vcmask 64512  }
  0x17   :  { %v126_v2 = vld [vmem:[#allocation8 + $0x18] sm:$0xff]  ;;  %178 = vmatpush.msra.mxu1 %v163_v0  ;;  %v125_v3 = vld [vmem:[#allocation8 + $0x10] sm:$0xff]  ;;  %v161_v4 = vld [vmem:[#allocation8 + $0x28] sm:$0xff]  ;;  %s2302_s5 = smov 112   ;;  %s2303_s11 = smov 120  }
  0x18   :  { %148 = vmatpush.msra.mxu0 %v126_v2  ;;  %v160_v5 = vld [vmem:[#allocation8 + $0x20] sm:$0xff]  ;;  %v124_v6 = vld [vmem:[#allocation8 + $0x8] sm:$0xff]  ;;  %s2304_s12 = smov 104   ;;  %v193_v20 = vld [vmem:[#allocation8 + $0x58] sm:$0xff]  ;;  %s2306_s28 = smov 16  }
  0x19   :  { %179 = vmatpush.msra.mxu1 %v162_v1  ;;  %v2389_v7 = vld [vmem:[#allocation2] sm:$0xff]  ;;  %v2395_v9 = vld [vmem:[#allocation2 + $0x8] sm:$0xff]  ;;  %v192_v21 = vld [vmem:[#allocation8 + $0x50] sm:$0xff]  ;;  %208 = vmatpush.msra.mxu2 %v193_v20  ;;  %s1952_s3 = sshll.u32 %s2840_s9, 4  ;;  %s1953_s3 = int_to_ptr.hbm [resolvable:$true] %s1952_s3 }
  0x1a   :  { %149 = vmatpush.msra.mxu0 %v125_v3  ;;  %v123_v8 = vld [vmem:[#allocation8] sm:$0xff]  ;;  %v191_v22 = vld [vmem:[#allocation8 + $0x48] sm:$0xff]  ;;  %v118_v54 = vld [vmem:[%s2833_s2 + $0x18] sm:$0xff] }
  0x1b   :  { %180 = vmatpush.msra.mxu1 %v161_v4  ;;  %v2049_v10 = vld [vmem:[#allocation10 + $0x1] ss:$0 sm:$0xff]  ;;  %v2050_v11 = vld [vmem:[#allocation10] ss:$0 sm:$0xff]  ;;  %209 = vmatpush.msra.mxu2 %v192_v21  ;;  %v2051_v44 = vld [vmem:[#allocation10 + $0x2] ss:$0 sm:$0xff] }
  0x1c   :  { %150 = vmatpush.msra.mxu0 %v124_v6  ;;  %v190_v23 = vld [vmem:[#allocation8 + $0x40] sm:$0xff]  ;;  %v116_v49 = vld [vmem:[%s2833_s2 + $0x8] sm:$0xff]  ;;  %v121_v60 = vld [vmem:[%s2833_s2 + $0x30] sm:$0xff] }
  0x1d   :  { %181 = vmatpush.msra.mxu1 %v160_v5  ;;  %210 = vmatpush.msra.mxu2 %v191_v22  ;;  %v115_v31 = vld [vmem:[%s2833_s2] sm:$0xff]  ;;  %v120_v58 = vld [vmem:[%s2833_s2 + $0x28] sm:$0xff]  ;;  %v122_v62 = vld [vmem:[%s2833_s2 + $0x38] sm:$0xff] }
  0x1e   :  { %151 = vmatpush.msra.mxu0 %v123_v8  ;;  %1969 = vmatmul.msk.f32.vlgmr.msra.gmra.mxu1 %vm129_vm0, %v2389_v7  ;;  %v119_v37 = vld [vmem:[%s2833_s2 + $0x20] sm:$0xff]  ;;  %v117_v6 = vld [vmem:[%s2833_s2 + $0x10] sm:$0xff]  ;;  %s2305_s2 = smov 24  }
  0x1f   :  { %1967 = vmatmul.msk.f32.vlgmr.msra.gmra.mxu0 %vm129_vm0, %v2389_v7  ;;  %211 = vmatpush.msra.mxu2 %v190_v23 }
  0x20   :  { %1971 = vmatmul.msk.f32.vlgmr.msra.gmra.mxu2 %vm129_vm0, %v2389_v7 }
  0x26   :  { %1970 = vmatmul.msk.f32.gmra.mxu1 %vm129_vm0, %v2395_v9 }
  0x27   :  { %1968 = vmatmul.msk.f32.gmra.mxu0 %vm129_vm0, %v2395_v9 }
  0x28   :  { %1972 = vmatmul.msk.f32.gmra.mxu2 %vm129_vm0, %v2395_v9 }
  0x9b   :  { %v183_v12 = vpop.f32.mrf.mxu1 }
  0x9c   :  { %v153_v13 = vpop.f32.mrf.mxu0  ;;  %v184_v14 = vadd.f32 %v2049_v10, %v183_v12 }
  0x9d   :  { %v154_v15 = vadd.f32 %v2050_v11, %v153_v13 }
  0x9e   :  { %239 = vrot.lane.b32.xlu1 %v184_v14, %s2302_s5  ;;  %235 = vrot.lane.b32.xlu0 %v184_v14, %s2303_s11 }
  0x9f   :  { %1973 = vmatpush.xpose.msk.msrb.mxu0 %vm267_vm1, %v184_v14 }
  0xa2   :  { %1974 = vmatmul.msk.f32.vlgmr.msrb.gmra.mxu0 %vm267_vm1, %v154_v15 }
  0xa3   :  { %v186_v16 = vpop.f32.mrf.mxu1  ;;  %v213_v45 = vpop.f32.mrf.mxu2 }
  0xa4   :  { %v156_v17 = vpop.f32.mrf.mxu0  ;;  %v187_v18 = vadd.f32 %v2049_v10, %v186_v16  ;;  %v2447_v46 = vadd.f32 %v2051_v44, %v213_v45 }
  0xa5   :  { %v157_v19 = vadd.f32 %v2050_v11, %v156_v17 }
  0xa6   :  { %237 = vrot.lane.b32.xlu2 %v187_v18, %s2303_s11  ;;  %1981 = vmatpush.xpose.msk.msrb.mxu1 %vm267_vm1, %v187_v18 }
  0xa7   :  { %225 = vrot.lane.b32.xlu1 %v154_v15, %s2302_s5  ;;  %221 = vrot.lane.b32.xlu0 %v154_v15, %s2303_s11 }
  0xa9   :  { %1982 = vmatmul.msk.f32.vlgmr.msrb.gmra.mxu1 %vm267_vm1, %v157_v19 }
  0xaa   :  { %670 = vmatpush.msra.mxu1 %v2447_v46 }
  0xab   :  { %v216_v47 = vpop.f32.mrf.mxu2 }
  0xac   :  { %v2450_v48 = vadd.f32 %v2051_v44, %v216_v47 }
  0xae   :  { %241 = vrot.lane.b32.xlu2 %v187_v18, %s2302_s5  ;;  %762 = vmatpush.msrb.mxu1 %v2450_v48 }
  0xaf   :  { %227 = vrot.lane.b32.xlu1 %v157_v19, %s2302_s5  ;;  %223 = vrot.lane.b32.xlu0 %v157_v19, %s2303_s11 }
  0xb6   :  { %243 = vrot.lane.b32.xlu2 %v184_v14, %s2304_s12 }
  0xb7   :  { %229 = vrot.lane.b32.xlu0 %v154_v15, %s2304_s12  ;;  %245 = vrot.lane.b32.xlu1 %v187_v18, %s2304_s12 }
  0xbe   :  { %231 = vrot.lane.b32.xlu2 %v157_v19, %s2304_s12 }
 0x100   :  { %v238_v24 = vpop.permute.xlu2 %237 }
 0x101   :  { %1983 = vmatpush.xpose.msk.msrb.mxu2 %vm267_vm1, %v238_v24 }
 0x108   :  { %v242_v25 = vpop.permute.xlu2 %241 }
 0x110   :  { %v244_v26 = vpop.permute.xlu2 %243  ;;  %v240_v27 = vpop.permute.xlu1 %239 }
 0x111   :  { %v236_v28 = vpop.permute.xlu0 %235  ;;  %1979 = vmatpush.xpose.msk.msra.mxu0 %vm267_vm1, %v244_v26 }
 0x112   :  { %1975 = vmatpush.xpose.msk.msra.mxu3 %vm267_vm1, %v236_v28 }
 0x116   :  { %1977 = vmatpush.xpose.msk.msrb.mxu3 %vm267_vm1, %v240_v27 }
 0x118   :  { %v232_v43 = vpop.permute.xlu2 %231 }
 0x119   :  { %v226_v29 = vpop.permute.xlu1 %225  ;;  %v222_v30 = vpop.permute.xlu0 %221 }
 0x11a   :  { %1976 = vmatmul.msk.f32.vlgmr.msra.gmra.mxu3 %vm267_vm1, %v222_v30 }
 0x11b   :  { %1985 = vmatpush.xpose.msk.msra.mxu3 %vm267_vm1, %v242_v25 }
 0x11f   :  { %v289_v32 = vpop.f32.mrf.mxu0 }
 0x120   :  { %v2430_v33 = vadd.f32 %v289_v32, %v115_v31 }
 0x121   :  { %v228_v34 = vpop.permute.xlu1 %227  ;;  %v224_v35 = vpop.permute.xlu0 %223 }
 0x122   :  { %1978 = vmatmul.msk.f32.vlgmr.msrb.gmra.mxu3 %vm267_vm1, %v226_v29  ;;  %1984 = vmatmul.msk.f32.vlgmr.msrb.gmra.mxu2 %vm267_vm1, %v224_v35  ;;  %v460_v36 = vsel %vm267_vm1, %v2430_v33, -inf }
 0x123   :  { %461 = vmax.xlane.f32.xlu2 %v460_v36 }
 0x126   :  { %v385_v38 = vpop.f32.mrf.mxu1 }
 0x127   :  { %v2439_v39 = vadd.f32 %v385_v38, %v119_v37 }
 0x129   :  { %v230_v40 = vpop.permute.xlu0 %229  ;;  %v472_v41 = vsel %vm267_vm1, %v2439_v39, -inf  ;;  %v246_v42 = vpop.permute.xlu1 %245 }
 0x12a   :  { %1980 = vmatmul.msk.f32.vlgmr.msra.gmra.mxu0 %vm267_vm1, %v230_v40  ;;  %1986 = vmatmul.msk.f32.vlgmr.msra.gmra.mxu3 %vm267_vm1, %v228_v34 }
 0x12b   :  { %473 = vmax.xlane.f32.xlu1 %v472_v41  ;;  %1987 = vmatpush.xpose.msk.msrb.mxu0 %vm267_vm1, %v246_v42 }
 0x132   :  { %1988 = vmatmul.msk.f32.vlgmr.msrb.gmra.mxu0 %vm267_vm1, %v232_v43 }
 0x196   :  { %v462_v11 = vpop.xlane.xlu2 %461 }
 0x19d   :  { %v313_v50 = vpop.f32.mrf.mxu3 }
 0x19e   :  { %v314_v51 = vadd.f32 %v313_v50, %v116_v49  ;;  %v474_v12 = vpop.xlane.xlu1 %473  ;;  %v484_v50 = vsub.f32 %v2430_v33, %v462_v11 }
 0x1a0   :  { %v463_v52 = vsel %vm267_vm1, %v314_v51, -inf }
 0x1a1   :  { %464 = vmax.xlane.f32.xlu0 %v463_v52  ;;  %v492_v52 = vmul.f32 1.442695, %v484_v50 }
 0x1a5   :  { %v337_v53 = vpop.f32.mrf.mxu3  ;;  %v409_v59 = vpop.f32.mrf.mxu2 }
 0x1a6   :  { %v410_v63 = vadd.f32 %v409_v59, %v120_v58  ;;  %v338_v8 = vadd.f32 %v337_v53, %v117_v6 }
 0x1a7   :  { %v361_v55 = vpop.f32.mrf.mxu0 }
 0x1a8   :  { %v362_v56 = vadd.f32 %v361_v55, %v118_v54  ;;  %v475_v5 = vsel %vm267_vm1, %v410_v63, -inf  ;;  %v466_v10 = vsel %vm267_vm1, %v338_v8, -inf }
 0x1aa   :  { %v469_v57 = vsel %vm267_vm1, %v362_v56, -inf }
 0x1ab   :  { %470 = vmax.xlane.f32.xlu2 %v469_v57 }
 0x1ad   :  { %v433_v61 = vpop.f32.mrf.mxu3 }
 0x1ae   :  { %v434_v0 = vadd.f32 %v433_v61, %v121_v60 }
 0x1af   :  { %v457_v1 = vpop.f32.mrf.mxu0 }
 0x1b0   :  { %v458_v2 = vadd.f32 %v457_v1, %v122_v62  ;;  %v478_v3 = vsel %vm267_vm1, %v434_v0, -inf }
 0x1b1   :  { %479 = vmax.xlane.f32.xlu0 %v478_v3 }
 0x1b2   :  { %v481_v4 = vsel %vm267_vm1, %v458_v2, -inf }
 0x1b3   :  { %482 = vmax.xlane.f32.xlu1 %v481_v4  ;;  %476 = vmax.xlane.f32.xlu2 %v475_v5 }
 0x1bb   :  { %467 = vmax.xlane.f32.xlu1 %v466_v10 }
 0x1c5   :  { %251 = vrot.lane.b32.xlu0 %v2450_v48, %s2303_s11 }
 0x1cb   :  { %255 = vrot.lane.b32.xlu2 %v2447_v46, %s2302_s5 }
 0x1d4   :  { %249 = vrot.lane.b32.xlu1 %v2447_v46, %s2303_s11 }
 0x214   :  { %v465_v13 = vpop.xlane.xlu0 %464 }
 0x215   :  { %v485_v16 = vsub.f32 %v314_v51, %v465_v13  ;;  %v488_v51 = vsub.f32 %v2439_v39, %v474_v12 }
 0x217   :  { %v494_v18 = vmul.f32 1.442695, %v485_v16  ;;  %v500_v53 = vmul.f32 1.442695, %v488_v51 }
 0x21e   :  { %v471_v14 = vpop.xlane.xlu2 %470 }
 0x21f   :  { %v487_v15 = vsub.f32 %v362_v56, %v471_v14 }
 0x221   :  { %v498_v17 = vmul.f32 1.442695, %v487_v15 }
 0x223   :  { %2065 = vpow2.f32 %v498_v17 }
 0x224   :  { %2067 = vpow2.f32 %v494_v18  ;;  %v480_v26 = vpop.xlane.xlu0 %479 }
 0x225   :  { %v490_v32 = vsub.f32 %v434_v0, %v480_v26 }
 0x226   :  { %v483_v19 = vpop.xlane.xlu1 %482  ;;  %v477_v20 = vpop.xlane.xlu2 %476 }
 0x227   :  { %v489_v21 = vsub.f32 %v410_v63, %v477_v20  ;;  %v491_v23 = vsub.f32 %v458_v2, %v483_v19  ;;  %v504_v38 = vmul.f32 1.442695, %v490_v32 }
 0x229   :  { %v2483_v22 = vpop.eup %2065  ;;  %v502_v24 = vmul.f32 1.442695, %v489_v21  ;;  %v506_v27 = vmul.f32 1.442695, %v491_v23 }
 0x22a   :  { %v517_v25 = vsel %vm267_vm1, %v2483_v22, 0.0  ;;  %v2487_v30 = vpop.eup %2067 }
 0x22b   :  { %518 = vadd.xlane.f32.xlu0 %v517_v25  ;;  %2069 = vpow2.f32 %v502_v24  ;;  %v511_v36 = vsel %vm267_vm1, %v2487_v30, 0.0 }
 0x22c   :  { %2071 = vpow2.f32 %v506_v27 }
 0x22e   :  { %v468_v28 = vpop.xlane.xlu1 %467  ;;  %v256_v29 = vpop.permute.xlu2 %255 }
 0x22f   :  { %v486_v31 = vsub.f32 %v338_v8, %v468_v28  ;;  %716 = vmatpush.msrb.mxu3 %v256_v29 }
 0x231   :  { %v496_v34 = vmul.f32 1.442695, %v486_v31  ;;  %v2489_v35 = vpop.eup %2069 }
 0x232   :  { %v523_v37 = vsel %vm267_vm1, %v2489_v35, 0.0  ;;  %v2495_v40 = vpop.eup %2071 }
 0x233   :  { %2073 = vpow2.f32 %v496_v34  ;;  %512 = vadd.xlane.f32.xlu0 %v511_v36  ;;  %524 = vadd.xlane.f32.xlu1 %v523_v37  ;;  %v529_v43 = vsel %vm267_vm1, %v2495_v40, 0.0 }
 0x234   :  { %2075 = vpow2.f32 %v504_v38 }
 0x235   :  { %2077 = vpow2.f32 %v492_v52 }
 0x236   :  { %2079 = vpow2.f32 %v500_v53 }
 0x237   :  { %v252_v49 = vpop.permute.xlu0 %251 }
 0x239   :  { %v2497_v41 = vpop.eup %2073 }
 0x23a   :  { %v514_v42 = vsel %vm267_vm1, %v2497_v41, 0.0  ;;  %v2503_v44 = vpop.eup %2075 }
 0x23b   :  { %515 = vadd.xlane.f32.xlu2 %v514_v42  ;;  %530 = vadd.xlane.f32.xlu0 %v529_v43  ;;  %v526_v45 = vsel %vm267_vm1, %v2503_v44, 0.0  ;;  %v2515_v54 = vpop.eup %2077 }
 0x23c   :  { %v2517_v55 = vpop.eup %2079 }
 0x23d   :  { %v520_v56 = vsel %vm267_vm1, %v2517_v55, 0.0 }
 0x243   :  { %527 = vadd.xlane.f32.xlu2 %v526_v45 }
 0x246   :  { %v250_v47 = vpop.permute.xlu1 %249 }
 0x247   :  { %693 = vmatpush.msra.mxu2 %v250_v47 }
 0x249   :  { %785 = vmatpush.msrb.mxu2 %v252_v49 }
 0x24c   :  { %261 = vrot.lane.b32.xlu1 %v2447_v46, %s2304_s12  ;;  %v508_v46 = vsel %vm267_vm1, %v2515_v54, 0.0 }
 0x24f   :  { %257 = vrot.lane.b32.xlu0 %v2450_v48, %s2302_s5 }
 0x25b   :  { %263 = vrot.lane.b32.xlu2 %v2450_v48, %s2304_s12 }
 0x276   :  { %509 = vadd.xlane.f32.xlu1 %v508_v46 }
 0x279   :  { %521 = vadd.xlane.f32.xlu0 %v520_v56 }
 0x29e   :  { %v519_v48 = vpop.xlane.xlu0 %518 }
 0x29f   :  { %2081 = vrcp.f32 %v519_v48  ;;  %vm579_vm5 = vweird.f32 %v519_v48  ;;  %v583_v14 = vand.u32 2147483647, %v519_v48  ;;  %v585_v15 = vand.u32 2147483648, %v519_v48 }
 0x2a1   :  { %v586_v29 = vor.u32 1.1754944e-38, %v585_v15  ;;  %vm584_vm11 = vcmp.eq.f32.partialorder %v583_v14, 8.507059e+37 }
 0x2a5   :  { %v2082_v33 = vpop.eup %2081 }
 0x2a6   :  { %v513_v39 = vpop.xlane.xlu0 %512  ;;  %v525_v57 = vpop.xlane.xlu1 %524  ;;  %v575_v58 = vmul.f32 %v2082_v33, %v519_v48  ;;  %vm580_vm3 = vweird.f32 %v2082_v33 }
 0x2a7   :  { %2083 = vrcp.f32 %v513_v39  ;;  %v557_v4 = vand.u32 2147483648, %v513_v39  ;;  %v555_v8 = vand.u32 2147483647, %v513_v39  ;;  %vm551_vm4 = vweird.f32 %v513_v39  ;;  %vm2536_vm8 = vmor %vm579_vm5, %vm580_vm3 }
 0x2a8   :  { %2085 = vrcp.f32 %v525_v57  ;;  %v576_v59 = vsub.f32 1.0, %v575_v58  ;;  %v613_v18 = vand.u32 2147483648, %v525_v57  ;;  %vm607_vm10 = vweird.f32 %v525_v57 }
 0x2a9   :  { %v558_v16 = vor.u32 1.1754944e-38, %v557_v4  ;;  %vm556_vm7 = vcmp.eq.f32.partialorder %v555_v8, 8.507059e+37  ;;  %v611_v31 = vand.u32 2147483647, %v525_v57 }
 0x2aa   :  { %v577_v2 = vmul.f32 %v2082_v33, %v576_v59  ;;  %v614_v43 = vor.u32 1.1754944e-38, %v613_v18 }
 0x2ab   :  { %vm612_vm14 = vcmp.eq.f32.partialorder %v611_v31, 8.507059e+37 }
 0x2ac   :  { %v578_v11 = vadd.f32 %v2082_v33, %v577_v2 }
 0x2ad   :  { %v2084_v60 = vpop.eup %2083 }
 0x2ae   :  { %v2086_v61 = vpop.eup %2085  ;;  %v547_v62 = vmul.f32 %v2084_v60, %v513_v39  ;;  %v2523_v63 = vpop.xlane.xlu0 %530  ;;  %vm552_vm2 = vweird.f32 %v2084_v60  ;;  %v582_v26 = vsel %vm2536_vm8, %v2082_v33, %v578_v11 }
 0x2af   :  { %v2525_v0 = vpop.xlane.xlu2 %515  ;;  %v603_v1 = vmul.f32 %v2086_v61, %v525_v57  ;;  %2087 = vrcp.f32 %v2523_v63  ;;  %vm553_vm6 = vmor %vm551_vm4, %vm552_vm2  ;;  %vm608_vm9 = vweird.f32 %v2086_v61  ;;  %v587_v38 = vsel %vm584_vm11, %v586_v29, %v582_v26 }
 0x2b0   :  { %v548_v3 = vsub.f32 1.0, %v547_v62  ;;  %2089 = vrcp.f32 %v2525_v0  ;;  %vm2545_vm12 = vmor %vm607_vm10, %vm608_vm9  ;;  %v571_v45 = vand.u32 2147483648, %v2525_v0  ;;  %v641_v47 = vand.u32 2147483648, %v2523_v63 }
 0x2b1   :  { %v604_v5 = vsub.f32 1.0, %v603_v1  ;;  %v569_v49 = vand.u32 2147483647, %v2525_v0  ;;  %vm565_vm2 = vweird.f32 %v2525_v0  ;;  %vm635_vm3 = vweird.f32 %v2523_v63 }
 0x2b2   :  { %v549_v6 = vmul.f32 %v2084_v60, %v548_v3  ;;  %v639_v56 = vand.u32 2147483647, %v2523_v63  ;;  %v572_v48 = vor.u32 1.1754944e-38, %v571_v45  ;;  %v647_v57 = vmul.f32 %v2483_v22, %v587_v38 }
 0x2b3   :  { %v605_v10 = vmul.f32 %v2086_v61, %v604_v5  ;;  %v642_v59 = vor.u32 1.1754944e-38, %v641_v47  ;;  %v872_v47 = vld [vmem:[#allocation8 + $0x78] sm:$0xff] }
 0x2b4   :  { %v550_v12 = vadd.f32 %v2084_v60, %v549_v6  ;;  %vm640_vm8 = vcmp.eq.f32.partialorder %v639_v56, 8.507059e+37 }
 0x2b5   :  { %v2529_v13 = vpop.eup %2087  ;;  %v606_v25 = vadd.f32 %v2086_v61, %v605_v10 }
 0x2b6   :  { %v554_v17 = vsel %vm553_vm6, %v2084_v60, %v550_v12  ;;  %v631_v19 = vmul.f32 %v2529_v13, %v2523_v63  ;;  %v2090_v21 = vpop.eup %2089  ;;  %vm636_vm15 = vweird.f32 %v2529_v13  ;;  %vm570_vm6 = vcmp.eq.f32.partialorder %v569_v49, 8.507059e+37  ;;  %v870_v49 = vld [vmem:[#allocation8 + $0x68] sm:$0xff] }
 0x2b7   :  { %v2533_v20 = vpop.xlane.xlu2 %527  ;;  %v559_v24 = vsel %vm556_vm7, %v558_v16, %v554_v17  ;;  %v561_v28 = vmul.f32 %v2090_v21, %v2525_v0  ;;  %v610_v42 = vsel %vm2545_vm12, %v2086_v61, %v606_v25  ;;  %vm566_vm13 = vweird.f32 %v2090_v21  ;;  %vm2563_vm5 = vmor %vm635_vm3, %vm636_vm15 }
 0x2b8   :  { %2091 = vrcp.f32 %v2533_v20  ;;  %v632_v27 = vsub.f32 1.0, %v631_v19  ;;  %v645_v32 = vmul.f32 %v2487_v30, %v559_v24  ;;  %v615_v52 = vsel %vm612_vm14, %v614_v43, %v610_v42  ;;  %vm567_vm4 = vmor %vm565_vm2, %vm566_vm13 }
 0x2b9   :  { %v562_v37 = vsub.f32 1.0, %v561_v28  ;;  %v627_v0 = vand.u32 2147483648, %v2533_v20  ;;  %v649_v22 = vmul.f32 %v2489_v35, %v615_v52  ;;  %v625_v3 = vand.u32 2147483647, %v2533_v20 }
 0x2ba   :  { %v633_v36 = vmul.f32 %v2529_v13, %v632_v27  ;;  %1990 = vmatmul.msk.f32.vlgmr.msra.gmra.mxu2 %vm267_vm1, %v645_v32  ;;  %vm621_vm9 = vweird.f32 %v2533_v20 }
 0x2bb   :  { %v563_v30 = vmul.f32 %v2090_v21, %v562_v37  ;;  %v628_v8 = vor.u32 1.1754944e-38, %v627_v0  ;;  %vm626_vm11 = vcmp.eq.f32.partialorder %v625_v3, 8.507059e+37 }
 0x2bc   :  { %v634_v51 = vadd.f32 %v2529_v13, %v633_v36 }
 0x2bd   :  { %v564_v53 = vadd.f32 %v2090_v21, %v563_v30  ;;  %v871_v30 = vld [vmem:[#allocation8 + $0x70] sm:$0xff] }
 0x2be   :  { %v2092_v50 = vpop.eup %2091  ;;  %v262_v33 = vpop.permute.xlu1 %261  ;;  %v638_v62 = vsel %vm2563_vm5, %v2529_v13, %v634_v51 }
 0x2bf   :  { %v617_v46 = vmul.f32 %v2092_v50, %v2533_v20  ;;  %v264_v39 = vpop.permute.xlu2 %263  ;;  %v568_v60 = vsel %vm567_vm4, %v2090_v21, %v564_v53  ;;  %739 = vmatpush.msra.mxu0 %v262_v33  ;;  %vm622_vm7 = vweird.f32 %v2092_v50  ;;  %v643_v5 = vsel %vm640_vm8, %v642_v59, %v638_v62 }
 0x2c0   :  { %v573_v63 = vsel %vm570_vm6, %v572_v48, %v568_v60  ;;  %1992 = vmatmul.msk.f32.vlgmr.msra.gmra.mxu0 %vm267_vm1, %v647_v57  ;;  %vm623_vm10 = vmor %vm621_vm9, %vm622_vm7  ;;  %v651_v11 = vmul.f32 %v2495_v40, %v643_v5  ;;  %vm862_vm6 = vcmask 130048   ;;  %vm865_vm7 = vcmask 195584  }
 0x2c1   :  { %v618_v61 = vsub.f32 1.0, %v617_v46  ;;  %v258_v1 = vpop.permute.xlu0 %257  ;;  %831 = vmatpush.msrb.mxu0 %v264_v39  ;;  %v646_v4 = vmul.f32 %v2497_v41, %v573_v63  ;;  %v2052_v63 = vld [vmem:[#allocation10 + $0x3] ss:$0 sm:$0xff] }
 0x2c2   :  { %808 = vmatpush.msra.mxu3 %v258_v1  ;;  %1994 = vmatmul.msk.f32.vlgmr.msrb.gmra.mxu2 %vm267_vm1, %v649_v22 }
 0x2c3   :  { %v619_v2 = vmul.f32 %v2092_v50, %v618_v61  ;;  %1991 = vmatmul.msk.f32.vlgmr.msrb.gmra.mxu3 %vm267_vm1, %v646_v4 }
 0x2c5   :  { %v620_v6 = vadd.f32 %v2092_v50, %v619_v2 }
 0x2c7   :  { %v624_v35 = vsel %vm623_vm10, %v2092_v50, %v620_v6  ;;  %v869_v50 = vld [vmem:[#allocation8 + $0x60] sm:$0xff] }
 0x2c8   :  { %v629_v10 = vsel %vm626_vm11, %v628_v8, %v624_v35  ;;  %1996 = vmatmul.msk.f32.vlgmr.msrb.gmra.mxu0 %vm267_vm1, %v651_v11  ;;  %v2307_v8 = vmov 32.0  }
 0x2c9   :  { %v650_v12 = vmul.f32 %v2503_v44, %v629_v10 }
 0x2cb   :  { %1995 = vmatmul.msk.f32.vlgmr.msra.gmra.mxu3 %vm267_vm1, %v650_v12 }
 0x2e9   :  { %v510_v41 = vpop.xlane.xlu1 %509 }
 0x2ea   :  { %2093 = vrcp.f32 %v510_v41  ;;  %v543_v19 = vand.u32 2147483648, %v510_v41  ;;  %v541_v21 = vand.u32 2147483647, %v510_v41  ;;  %vm537_vm13 = vweird.f32 %v510_v41 }
 0x2ec   :  { %v522_v13 = vpop.xlane.xlu0 %521  ;;  %v544_v24 = vor.u32 1.1754944e-38, %v543_v19  ;;  %vm542_vm15 = vcmp.eq.f32.partialorder %v541_v21, 8.507059e+37 }
 0x2ed   :  { %2095 = vrcp.f32 %v522_v13  ;;  %v599_v28 = vand.u32 2147483648, %v522_v13  ;;  %vm593_vm3 = vweird.f32 %v522_v13  ;;  %v597_v29 = vand.u32 2147483647, %v522_v13 }
 0x2ee   :  { %2097 = vrcp.f32 %v2307_v8 }
 0x2ef   :  { %v600_v34 = vor.u32 1.1754944e-38, %v599_v28  ;;  %vm598_vm5 = vcmp.eq.f32.partialorder %v597_v29, 8.507059e+37  ;;  %v975_v28 = vld [vmem:[#allocation8 + $0x88] sm:$0xff]  ;;  %v974_v29 = vld [vmem:[#allocation8 + $0x80] sm:$0xff] }
 0x2f0   :  { %v2094_v14 = vpop.eup %2093 }
 0x2f1   :  { %v533_v15 = vmul.f32 %v2094_v14, %v510_v41  ;;  %vm538_vm12 = vweird.f32 %v2094_v14 }
 0x2f2   :  { %vm539_vm14 = vmor %vm537_vm13, %vm538_vm12 }
 0x2f3   :  { %v2096_v16 = vpop.eup %2095  ;;  %v534_v17 = vsub.f32 1.0, %v533_v15 }
 0x2f4   :  { %v589_v18 = vmul.f32 %v2096_v16, %v522_v13  ;;  %vm594_vm2 = vweird.f32 %v2096_v16  ;;  %v2098_v35 = vpop.eup %2097 }
 0x2f5   :  { %v535_v20 = vmul.f32 %v2094_v14, %v534_v17  ;;  %vm595_vm4 = vmor %vm593_vm3, %vm594_vm2  ;;  %v913_v10 = vmul.f32 32.0, %v2098_v35  ;;  %vm917_vm8 = vweird.f32 %v2098_v35 }
 0x2f6   :  { %v590_v40 = vsub.f32 1.0, %v589_v18 }
 0x2f7   :  { %v536_v23 = vadd.f32 %v2094_v14, %v535_v20  ;;  %v914_v11 = vsub.f32 1.0, %v913_v10 }
 0x2f8   :  { %v591_v44 = vmul.f32 %v2096_v16, %v590_v40  ;;  %v1013_v40 = vld [vmem:[#allocation8 + $0xb8] sm:$0xff] }
 0x2f9   :  { %v540_v25 = vsel %vm539_vm14, %v2094_v14, %v536_v23  ;;  %v915_v12 = vmul.f32 %v2098_v35, %v914_v11  ;;  %1034 = vmatpush.msrb.mxu3 %v1013_v40  ;;  %v1012_v23 = vld [vmem:[#allocation8 + $0xb0] sm:$0xff] }
 0x2fa   :  { %v592_v26 = vadd.f32 %v2096_v16, %v591_v44  ;;  %v545_v27 = vsel %vm542_vm15, %v544_v24, %v540_v25  ;;  %v1011_v44 = vld [vmem:[#allocation8 + $0xa8] sm:$0xff]  ;;  %v1010_v24 = vld [vmem:[#allocation8 + $0xa0] sm:$0xff]  ;;  %v2610_v25 = vld [vmem:[#allocation5] sm:$0xff] }
 0x2fb   :  { %v644_v31 = vmul.f32 %v2515_v54, %v545_v27  ;;  %v916_v41 = vadd.f32 %v2098_v35, %v915_v12  ;;  %1035 = vmatpush.msrb.mxu3 %v1012_v23  ;;  %v976_v27 = vld [vmem:[#allocation8 + $0x90] sm:$0xff]  ;;  %v1049_v12 = vld [vmem:[#allocation8 + $0xd8] sm:$0xff] }
 0x2fc   :  { %v596_v32 = vsel %vm595_vm4, %v2096_v16, %v592_v26  ;;  %v977_v26 = vld [vmem:[#allocation8 + $0x98] sm:$0xff]  ;;  %1064 = vmatpush.msra.mxu0 %v1049_v12 }
 0x2fd   :  { %1989 = vmatmul.msk.f32.vlgmr.msra.gmra.mxu1 %vm267_vm1, %v644_v31  ;;  %v601_v36 = vsel %vm598_vm5, %v600_v34, %v596_v32  ;;  %v2604_v13 = vsel %vm917_vm8, %v2098_v35, %v916_v41  ;;  %1036 = vmatpush.msrb.mxu3 %v1011_v44  ;;  %v1048_v41 = vld [vmem:[#allocation8 + $0xd0] sm:$0xff]  ;;  %v969_v44 = vld [vmem:[#allocation7 + $0x20] sm:$0xff] }
 0x2fe   :  { %v648_v37 = vmul.f32 %v2517_v55, %v601_v36  ;;  %893 = vmatpush.msra.mxu1 %v872_v47  ;;  %998 = vmatpush.msra.mxu2 %v977_v26  ;;  %v2614_v36 = vld [vmem:[#allocation5 + $0x8] sm:$0xff] }
 0x2ff   :  { %1037 = vmatpush.msrb.mxu3 %v1010_v24  ;;  %1065 = vmatpush.msra.mxu0 %v1048_v41 }
 0x300   :  { %894 = vmatpush.msra.mxu1 %v871_v30  ;;  %2001 = vmatmul.msk.f32.vlgmr.msrb.gmra.mxu3 %vm129_vm0, %v2610_v25 }
 0x301   :  { %999 = vmatpush.msra.mxu2 %v976_v27 }
 0x302   :  { %895 = vmatpush.msra.mxu1 %v870_v49  ;;  %v2053_v49 = vld [vmem:[#allocation10 + $0x8] ss:$0 sm:$0xff] }
 0x303   :  { %1000 = vmatpush.msra.mxu2 %v975_v28 }
 0x304   :  { %896 = vmatpush.msra.mxu1 %v869_v50 }
 0x305   :  { %1993 = vmatmul.msk.f32.vlgmr.msrb.gmra.mxu1 %vm267_vm1, %v648_v37  ;;  %1001 = vmatpush.msra.mxu2 %v974_v29 }
 0x308   :  { %2002 = vmatmul.msk.f32.gmra.mxu3 %vm129_vm0, %v2614_v36 }
 0x33d   :  { %v741_v38 = vpop.f32.mrf.mxu0  ;;  %v695_v42 = vpop.f32.mrf.mxu2 }
 0x33e   :  { %854 = vrot.lane.b32.xlu2 %v741_v38, %s2305_s2 }
 0x345   :  { %v833_v43 = vpop.f32.mrf.mxu0  ;;  %v787_v45 = vpop.f32.mrf.mxu2 }
 0x346   :  { %838 = vrot.lane.b32.xlu2 %v695_v42, %s2297_s18  ;;  %856 = vrot.lane.b32.xlu1 %v833_v43, %s2305_s2  ;;  %v718_v54 = vpop.f32.mrf.mxu3 }
 0x34e   :  { %846 = vrot.lane.b32.xlu2 %v718_v54, %s2306_s28  ;;  %v810_v55 = vpop.f32.mrf.mxu3 }
 0x356   :  { %840 = vrot.lane.b32.xlu2 %v787_v45, %s2297_s18 }
 0x35e   :  { %848 = vrot.lane.b32.xlu2 %v810_v55, %s2306_s28 }
 0x37a   :  { %v672_v53 = vpop.f32.mrf.mxu1 }
 0x382   :  { %v764_v57 = vpop.f32.mrf.mxu1 }
 0x398   :  { %v855_v51 = vpop.permute.xlu2 %854 }
 0x3a0   :  { %v839_v52 = vpop.permute.xlu2 %838 }
 0x3a1   :  { %v860_v46 = vsel %vm267_vm1, %v672_v53, %v839_v52  ;;  %v2054_v52 = vld [vmem:[#allocation10 + $0x9] ss:$0 sm:$0xff] }
 0x3a8   :  { %v847_v56 = vpop.permute.xlu2 %846 }
 0x3a9   :  { %v863_v48 = vsel %vm862_vm6, %v860_v46, %v847_v56 }
 0x3aa   :  { %v866_v33 = vsel %vm865_vm7, %v863_v48, %v855_v51 }
 0x3ab   :  { %1997 = vmatmul.msk.f32.vlgmr.msra.gmra.mxu1 %vm129_vm0, %v866_v33 }
 0x3b0   :  { %v841_v39 = vpop.permute.xlu2 %840 }
 0x3b1   :  { %v861_v58 = vsel %vm267_vm1, %v764_v57, %v841_v39 }
 0x3b8   :  { %v857_v59 = vpop.permute.xlu1 %856  ;;  %v849_v60 = vpop.permute.xlu2 %848 }
 0x3b9   :  { %v864_v61 = vsel %vm862_vm6, %v861_v58, %v849_v60 }
 0x3ba   :  { %v867_v62 = vsel %vm865_vm7, %v864_v61, %v857_v59 }
 0x3bb   :  { %1998 = vmatmul.msk.f32.gmra.mxu1 %vm129_vm0, %v867_v62 }
 0x428   :  { %v898_v0 = vpop.f32.mrf.mxu1 }
 0x429   :  { %v899_v1 = vadd.f32 %v2052_v63, %v898_v0  ;;  %v1039_v0 = vpop.f32.mrf.mxu3 }
 0x42b   :  { %v904_v22 = vadd.f32 %v899_v1, %v2389_v7 }
 0x42d   :  { %v906_v2 = vsel %vm129_vm0, %v904_v22, 0.0 }
 0x42e   :  { %907 = vadd.xlane.f32.xlu0 %v906_v2 }
 0x438   :  { %v901_v3 = vpop.f32.mrf.mxu1 }
 0x439   :  { %v902_v4 = vadd.f32 %v2052_v63, %v901_v3  ;;  %v2055_v63 = vld [vmem:[#allocation10 + $0x5] ss:$0 sm:$0xff]  ;;  %v2056_v3 = vld [vmem:[#allocation10 + $0x4] ss:$0 sm:$0xff] }
 0x43a   :  { %v1040_v1 = vadd.f32 %v2055_v63, %v1039_v0 }
 0x43b   :  { %v905_v5 = vadd.f32 %v902_v4, %v2395_v9 }
 0x43c   :  { %2005 = vmatpush.xpose.msk.msrb.mxu1 %vm267_vm1, %v1040_v1  ;;  %1091 = vrot.lane.b32.xlu1 %v1040_v1, %s2303_s11 }
 0x43d   :  { %v909_v6 = vsel %vm129_vm0, %v905_v5, 0.0 }
 0x43e   :  { %910 = vadd.xlane.f32.xlu2 %v909_v6 }
 0x4a1   :  { %v908_v7 = vpop.xlane.xlu0 %907 }
 0x4a2   :  { %v919_v14 = vmul.f32 %v2604_v13, %v908_v7  ;;  %v1047_v7 = vld [vmem:[#allocation8 + $0xc8] sm:$0xff] }
 0x4a3   :  { %1066 = vmatpush.msra.mxu0 %v1047_v7 }
 0x4a4   :  { %v921_v15 = vsub.f32 %v904_v22, %v919_v14  ;;  %v1042_v22 = vpop.f32.mrf.mxu3  ;;  %v1046_v14 = vld [vmem:[#allocation8 + $0xc0] sm:$0xff] }
 0x4a5   :  { %v1043_v2 = vadd.f32 %v2055_v63, %v1042_v22  ;;  %1067 = vmatpush.msra.mxu0 %v1046_v14 }
 0x4a6   :  { %v923_v16 = vmul.f32 %v921_v15, %v921_v15  ;;  %2003 = vmatmul.msk.f32.vlgmr.msra.gmra.mxu0 %vm129_vm0, %v2610_v25 }
 0x4a7   :  { %1093 = vrot.lane.b32.xlu2 %v1043_v2, %s2303_s11  ;;  %2013 = vmatpush.xpose.msk.msra.mxu1 %vm267_vm1, %v1043_v2 }
 0x4a8   :  { %v925_v9 = vsel %vm129_vm0, %v923_v16, 0.0 }
 0x4a9   :  { %926 = vadd.xlane.f32.xlu0 %v925_v9 }
 0x4ae   :  { %v1092_v35 = vpop.permute.xlu1 %1091  ;;  %2004 = vmatmul.msk.f32.gmra.mxu0 %vm129_vm0, %v2614_v36 }
 0x4af   :  { %2007 = vmatpush.xpose.msk.msrb.mxu2 %vm267_vm1, %v1092_v35 }
 0x4b1   :  { %v911_v17 = vpop.xlane.xlu2 %910 }
 0x4b2   :  { %v920_v18 = vmul.f32 %v2604_v13, %v911_v17  ;;  %v965_v17 = vld [vmem:[#allocation7] sm:$0xff] }
 0x4b4   :  { %v922_v19 = vsub.f32 %v905_v5, %v920_v18 }
 0x4b6   :  { %v924_v20 = vmul.f32 %v922_v19, %v922_v19 }
 0x4b8   :  { %v928_v21 = vsel %vm129_vm0, %v924_v20, 0.0 }
 0x4b9   :  { %929 = vadd.xlane.f32.xlu0 %v928_v21 }
 0x4cd   :  { %1095 = vrot.lane.b32.xlu0 %v1040_v1, %s2302_s5 }
 0x4d5   :  { %1097 = vrot.lane.b32.xlu0 %v1043_v2, %s2302_s5 }
 0x501   :  { %v1094_v10 = vpop.permute.xlu2 %1093 }
 0x51c   :  { %v927_v31 = vpop.xlane.xlu0 %926 }
 0x51d   :  { %v931_v32 = vmul.f32 0.032258064, %v927_v31  ;;  %v2057_v31 = vld [vmem:[#allocation10 + $0x6] ss:$0 sm:$0xff] }
 0x51f   :  { %v934_v34 = vadd.f32 1e-12, %v931_v32 }
 0x521   :  { %2099 = vrsqrt.f32 %v934_v34  ;;  %vm942_vm10 = vweird.f32 %v934_v34 }
 0x523   :  { %v1069_v32 = vpop.f32.mrf.mxu0 }
 0x527   :  { %v2100_v37 = vpop.eup %2099 }
 0x528   :  { %v937_v38 = vmul.f32 %v2100_v37, %v934_v34  ;;  %vm943_vm9 = vweird.f32 %v2100_v37  ;;  %v2666_v34 = vadd.f32 %v2057_v31, %v1069_v32 }
 0x529   :  { %vm944_vm11 = vmor %vm942_vm10, %vm943_vm9 }
 0x52a   :  { %v938_v42 = vmul.f32 %v2100_v37, %v937_v38  ;;  %v966_v38 = vld [vmem:[#allocation7 + $0x8] sm:$0xff] }
 0x52b   :  { %v1072_v36 = vpop.f32.mrf.mxu0 }
 0x52c   :  { %v939_v43 = vmul.f32 0.5, %v938_v42  ;;  %v930_v54 = vpop.xlane.xlu0 %929 }
 0x52d   :  { %v932_v45 = vmul.f32 0.032258064, %v930_v54 }
 0x52e   :  { %v940_v55 = vsub.f32 1.5, %v939_v43 }
 0x52f   :  { %v935_v47 = vadd.f32 1e-12, %v932_v45  ;;  %v967_v45 = vld [vmem:[#allocation7 + $0x10] sm:$0xff] }
 0x530   :  { %v941_v30 = vmul.f32 %v2100_v37, %v940_v55 }
 0x531   :  { %2101 = vrsqrt.f32 %v935_v47  ;;  %vm952_vm13 = vweird.f32 %v935_v47 }
 0x532   :  { %v945_v50 = vsel %vm944_vm11, %v2100_v37, %v941_v30  ;;  %v2669_v37 = vadd.f32 %v2057_v31, %v1072_v36 }
 0x533   :  { %v956_v51 = vmul.f32 %v945_v50, %v921_v15  ;;  %v970_v50 = vld [vmem:[#allocation7 + $0x28] sm:$0xff] }
 0x535   :  { %v959_v53 = vmul.f32 %v2053_v49, %v956_v51 }
 0x537   :  { %v2102_v46 = vpop.eup %2101  ;;  %v2618_v56 = vadd.f32 %v2054_v52, %v959_v53 }
 0x538   :  { %v947_v48 = vmul.f32 %v2102_v46, %v935_v47  ;;  %vm953_vm12 = vweird.f32 %v2102_v46 }
 0x539   :  { %1999 = vmatmul.msk.f32.vlgmr.msra.gmra.mxu2 %vm129_vm0, %v2618_v56  ;;  %vm954_vm14 = vmor %vm952_vm13, %vm953_vm12 }
 0x53a   :  { %v948_v33 = vmul.f32 %v2102_v46, %v947_v48  ;;  %2015 = vmatpush.xpose.msk.msra.mxu2 %vm267_vm1, %v1094_v10 }
 0x53c   :  { %v949_v39 = vmul.f32 0.5, %v948_v33 }
 0x53e   :  { %v950_v57 = vsub.f32 1.5, %v949_v39  ;;  %v968_v39 = vld [vmem:[#allocation7 + $0x18] sm:$0xff] }
 0x53f   :  { %v1096_v11 = vpop.permute.xlu0 %1095 }
 0x540   :  { %v951_v58 = vmul.f32 %v2102_v46, %v950_v57  ;;  %2009 = vmatpush.xpose.msk.msra.mxu3 %vm267_vm1, %v1096_v11 }
 0x542   :  { %v955_v59 = vsel %vm954_vm14, %v2102_v46, %v951_v58 }
 0x543   :  { %v957_v60 = vmul.f32 %v955_v59, %v922_v19 }
 0x545   :  { %v960_v61 = vmul.f32 %v2053_v49, %v957_v60  ;;  %v971_v49 = vld [vmem:[#allocation7 + $0x30] sm:$0xff]  ;;  %v972_v60 = vld [vmem:[#allocation7 + $0x38] sm:$0xff] }
 0x547   :  { %v2622_v62 = vadd.f32 %v2054_v52, %v960_v61  ;;  %v1098_v15 = vpop.permute.xlu0 %1097 }
 0x548   :  { %2017 = vmatpush.xpose.msk.msrb.mxu3 %vm267_vm1, %v1098_v15 }
 0x549   :  { %2000 = vmatmul.msk.f32.gmra.mxu2 %vm129_vm0, %v2622_v62 }
 0x5bc   :  { %v1003_v4 = vpop.f32.mrf.mxu2 }
 0x5bd   :  { %v1004_v5 = vadd.f32 %v2056_v3, %v1003_v4 }
 0x5bf   :  { %1077 = vrot.lane.b32.xlu1 %v1004_v5, %s2303_s11  ;;  %2006 = vmatmul.msk.f32.vlgmr.msrb.gmra.mxu1 %vm267_vm1, %v1004_v5 }
 0x5c0   :  { %1525 = vmatpush.msrb.mxu1 %v2666_v34 }
 0x5c7   :  { %1081 = vrot.lane.b32.xlu1 %v1004_v5, %s2302_s5 }
 0x5cc   :  { %v1006_v6 = vpop.f32.mrf.mxu2 }
 0x5cd   :  { %v1007_v8 = vadd.f32 %v2056_v3, %v1006_v6 }
 0x5cf   :  { %1087 = vrot.lane.b32.xlu2 %v1007_v8, %s2304_s12  ;;  %1083 = vrot.lane.b32.xlu0 %v1007_v8, %s2302_s5 }
 0x5d0   :  { %1079 = vrot.lane.b32.xlu1 %v1007_v8, %s2303_s11  ;;  %2014 = vmatmul.msk.f32.vlgmr.msra.gmra.mxu1 %vm267_vm1, %v1007_v8 }
 0x5d1   :  { %1617 = vmatpush.msra.mxu1 %v2669_v37 }
 0x5d7   :  { %1085 = vrot.lane.b32.xlu0 %v1004_v5, %s2304_s12 }
 0x5d8   :  { %1099 = vrot.lane.b32.xlu1 %v1040_v1, %s2304_s12 }
 0x5e0   :  { %1101 = vrot.lane.b32.xlu1 %v1043_v2, %s2304_s12 }
 0x629   :  { %v1088_v29 = vpop.permute.xlu2 %1087 }
 0x631   :  { %v1078_v16 = vpop.permute.xlu1 %1077 }
 0x632   :  { %2008 = vmatmul.msk.f32.vlgmr.msrb.gmra.mxu2 %vm267_vm1, %v1078_v16 }
 0x639   :  { %v1082_v9 = vpop.permute.xlu1 %1081 }
 0x63a   :  { %2010 = vmatmul.msk.f32.vlgmr.msra.gmra.mxu3 %vm267_vm1, %v1082_v9 }
 0x63c   :  { %v1144_v18 = vpop.f32.mrf.mxu1 }
 0x63d   :  { %v2652_v19 = vadd.f32 %v1144_v18, %v965_v17 }
 0x63f   :  { %v1315_v20 = vsel %vm267_vm1, %v2652_v19, -inf }
 0x640   :  { %1316 = vmax.xlane.f32.xlu0 %v1315_v20 }
 0x641   :  { %v1084_v21 = vpop.permute.xlu0 %1083 }
 0x642   :  { %v1080_v40 = vpop.permute.xlu1 %1079  ;;  %2018 = vmatmul.msk.f32.vlgmr.msrb.gmra.mxu3 %vm267_vm1, %v1084_v21 }
 0x643   :  { %2016 = vmatmul.msk.f32.vlgmr.msra.gmra.mxu2 %vm267_vm1, %v1080_v40 }
 0x649   :  { %v1086_v24 = vpop.permute.xlu0 %1085 }
 0x64a   :  { %v1100_v23 = vpop.permute.xlu1 %1099 }
 0x64b   :  { %2011 = vmatpush.xpose.msk.msrb.mxu0 %vm267_vm1, %v1100_v23 }
 0x64d   :  { %v1240_v25 = vpop.f32.mrf.mxu1 }
 0x64e   :  { %v2659_v26 = vadd.f32 %v1240_v25, %v969_v44  ;;  %2012 = vmatmul.msk.f32.vlgmr.msrb.gmra.mxu0 %vm267_vm1, %v1086_v24 }
 0x650   :  { %v1327_v27 = vsel %vm267_vm1, %v2659_v26, -inf }
 0x651   :  { %1328 = vmax.xlane.f32.xlu2 %v1327_v27 }
 0x652   :  { %v1102_v28 = vpop.permute.xlu1 %1101 }
 0x653   :  { %2019 = vmatpush.xpose.msk.msra.mxu0 %vm267_vm1, %v1102_v28 }
 0x656   :  { %2020 = vmatmul.msk.f32.vlgmr.msra.gmra.mxu0 %vm267_vm1, %v1088_v29 }
 0x6b3   :  { %v1317_v1 = vpop.xlane.xlu0 %1316 }
 0x6b5   :  { %v1168_v42 = vpop.f32.mrf.mxu2 }
 0x6b6   :  { %v1169_v43 = vadd.f32 %v1168_v42, %v966_v38 }
 0x6b8   :  { %v1318_v54 = vsel %vm267_vm1, %v1169_v43, -inf }
 0x6b9   :  { %1319 = vmax.xlane.f32.xlu0 %v1318_v54 }
 0x6bd   :  { %v1192_v55 = vpop.f32.mrf.mxu3 }
 0x6be   :  { %v1193_v47 = vadd.f32 %v1192_v55, %v967_v45 }
 0x6c0   :  { %v1321_v30 = vsel %vm267_vm1, %v1193_v47, -inf }
 0x6c1   :  { %1322 = vmax.xlane.f32.xlu1 %v1321_v30 }
 0x6c4   :  { %v1329_v5 = vpop.xlane.xlu2 %1328 }
 0x6c5   :  { %v1288_v51 = vpop.f32.mrf.mxu3  ;;  %v1343_v45 = vsub.f32 %v2659_v26, %v1329_v5 }
 0x6c6   :  { %v1264_v52 = vpop.f32.mrf.mxu2  ;;  %v1289_v53 = vadd.f32 %v1288_v51, %v971_v49 }
 0x6c7   :  { %v1265_v46 = vadd.f32 %v1264_v52, %v970_v50  ;;  %v1355_v55 = vmul.f32 1.442695, %v1343_v45 }
 0x6c8   :  { %v1333_v48 = vsel %vm267_vm1, %v1289_v53, -inf }
 0x6c9   :  { %1334 = vmax.xlane.f32.xlu1 %v1333_v48  ;;  %v1330_v33 = vsel %vm267_vm1, %v1265_v46, -inf }
 0x6ca   :  { %1331 = vmax.xlane.f32.xlu0 %v1330_v33 }
 0x6cb   :  { %v1216_v57 = vpop.f32.mrf.mxu0 }
 0x6cc   :  { %v1217_v58 = vadd.f32 %v1216_v57, %v968_v39 }
 0x6ce   :  { %v1324_v59 = vsel %vm267_vm1, %v1217_v58, -inf }
 0x6cf   :  { %1325 = vmax.xlane.f32.xlu2 %v1324_v59 }
 0x6d3   :  { %v1312_v61 = vpop.f32.mrf.mxu0 }
 0x6d4   :  { %v1313_v63 = vadd.f32 %v1312_v61, %v972_v60 }
 0x6d6   :  { %v1336_v0 = vsel %vm267_vm1, %v1313_v63, -inf }
 0x6d7   :  { %1337 = vmax.xlane.f32.xlu2 %v1336_v0 }
 0x6de   :  { %1111 = vrot.lane.b32.xlu0 %v2666_v34, %s2302_s5 }
 0x6e2   :  { %1107 = vrot.lane.b32.xlu1 %v2669_v37, %s2303_s11 }
 0x6ef   :  { %1105 = vrot.lane.b32.xlu2 %v2666_v34, %s2303_s11 }
 0x72c   :  { %v1320_v2 = vpop.xlane.xlu0 %1319 }
 0x72d   :  { %v1340_v16 = vsub.f32 %v1169_v43, %v1320_v2  ;;  %v1339_v43 = vsub.f32 %v2652_v19, %v1317_v1 }
 0x72f   :  { %v1349_v21 = vmul.f32 1.442695, %v1340_v16  ;;  %v1347_v54 = vmul.f32 1.442695, %v1339_v43 }
 0x734   :  { %v1323_v22 = vpop.xlane.xlu1 %1322 }
 0x735   :  { %v1341_v3 = vsub.f32 %v1193_v47, %v1323_v22 }
 0x737   :  { %v1351_v4 = vmul.f32 1.442695, %v1341_v3 }
 0x739   :  { %2103 = vpow2.f32 %v1351_v4 }
 0x73c   :  { %v1335_v6 = vpop.xlane.xlu1 %1334 }
 0x73d   :  { %v1345_v8 = vsub.f32 %v1289_v53, %v1335_v6  ;;  %v1332_v35 = vpop.xlane.xlu0 %1331 }
 0x73e   :  { %v1344_v10 = vsub.f32 %v1265_v46, %v1332_v35 }
 0x73f   :  { %v2684_v11 = vpop.eup %2103  ;;  %v1359_v12 = vmul.f32 1.442695, %v1345_v8 }
 0x740   :  { %v1357_v41 = vmul.f32 1.442695, %v1344_v10  ;;  %v1369_v7 = vsel %vm267_vm1, %v2684_v11, 0.0 }
 0x741   :  { %2105 = vpow2.f32 %v1359_v12  ;;  %1370 = vadd.xlane.f32.xlu0 %v1369_v7 }
 0x742   :  { %2107 = vpow2.f32 %v1357_v41  ;;  %v1326_v14 = vpop.xlane.xlu2 %1325 }
 0x743   :  { %v1342_v15 = vsub.f32 %v1217_v58, %v1326_v14 }
 0x745   :  { %v1353_v9 = vmul.f32 1.442695, %v1342_v15 }
 0x747   :  { %v2688_v17 = vpop.eup %2105  ;;  %2109 = vpow2.f32 %v1353_v9 }
 0x748   :  { %v2690_v18 = vpop.eup %2107  ;;  %v1381_v20 = vsel %vm267_vm1, %v2688_v17, 0.0  ;;  %2111 = vpow2.f32 %v1349_v21 }
 0x749   :  { %1382 = vadd.xlane.f32.xlu0 %v1381_v20  ;;  %v1378_v40 = vsel %vm267_vm1, %v2690_v18, 0.0 }
 0x74a   :  { %1379 = vadd.xlane.f32.xlu2 %v1378_v40  ;;  %v1338_v23 = vpop.xlane.xlu2 %1337 }
 0x74b   :  { %v1346_v24 = vsub.f32 %v1313_v63, %v1338_v23 }
 0x74d   :  { %v2696_v44 = vpop.eup %2109  ;;  %v1361_v28 = vmul.f32 1.442695, %v1346_v24 }
 0x74e   :  { %v1372_v25 = vsel %vm267_vm1, %v2696_v44, 0.0  ;;  %v2700_v31 = vpop.eup %2111 }
 0x74f   :  { %1373 = vadd.xlane.f32.xlu1 %v1372_v25  ;;  %2113 = vpow2.f32 %v1361_v28  ;;  %v1366_v36 = vsel %vm267_vm1, %v2700_v31, 0.0 }
 0x750   :  { %v1112_v27 = vpop.permute.xlu0 %1111  ;;  %2115 = vpow2.f32 %v1347_v54 }
 0x751   :  { %1571 = vmatpush.msra.mxu3 %v1112_v27  ;;  %2117 = vpow2.f32 %v1355_v55 }
 0x752   :  { %v1106_v29 = vpop.permute.xlu2 %1105 }
 0x753   :  { %1548 = vmatpush.msrb.mxu2 %v1106_v29 }
 0x754   :  { %v1108_v32 = vpop.permute.xlu1 %1107 }
 0x755   :  { %1640 = vmatpush.msra.mxu2 %v1108_v32  ;;  %v2704_v38 = vpop.eup %2113 }
 0x756   :  { %v1384_v42 = vsel %vm267_vm1, %v2704_v38, 0.0  ;;  %v2716_v47 = vpop.eup %2115 }
 0x757   :  { %1367 = vadd.xlane.f32.xlu1 %v1366_v36  ;;  %v2720_v30 = vpop.eup %2117 }
 0x758   :  { %v1375_v19 = vsel %vm267_vm1, %v2720_v30, 0.0 }
 0x75d   :  { %1117 = vrot.lane.b32.xlu0 %v2666_v34, %s2304_s12  ;;  %v1363_v34 = vsel %vm267_vm1, %v2716_v47, 0.0 }
 0x75f   :  { %1385 = vadd.xlane.f32.xlu1 %v1384_v42 }
 0x762   :  { %1113 = vrot.lane.b32.xlu2 %v2669_v37, %s2302_s5 }
 0x778   :  { %1119 = vrot.lane.b32.xlu1 %v2669_v37, %s2304_s12 }
 0x787   :  { %1364 = vadd.xlane.f32.xlu0 %v1363_v34 }
 0x78b   :  { %1376 = vadd.xlane.f32.xlu2 %v1375_v19 }
 0x7b4   :  { %v1371_v49 = vpop.xlane.xlu0 %1370 }
 0x7b5   :  { %2119 = vrcp.f32 %v1371_v49  ;;  %v1426_v53 = vand.u32 2147483648, %v1371_v49  ;;  %v1424_v48 = vand.u32 2147483647, %v1371_v49  ;;  %vm1420_vm2 = vweird.f32 %v1371_v49 }
 0x7b7   :  { %v1427_v58 = vor.u32 1.1754944e-38, %v1426_v53  ;;  %vm1425_vm4 = vcmp.eq.f32.partialorder %v1424_v48, 8.507059e+37 }
 0x7bb   :  { %v2120_v37 = vpop.eup %2119 }
 0x7bc   :  { %v1416_v50 = vmul.f32 %v2120_v37, %v1371_v49  ;;  %v1383_v26 = vpop.xlane.xlu0 %1382  ;;  %vm1421_vm15 = vweird.f32 %v2120_v37 }
 0x7bd   :  { %2121 = vrcp.f32 %v1383_v26  ;;  %v2724_v51 = vpop.xlane.xlu2 %1379  ;;  %vm1422_vm3 = vmor %vm1420_vm2, %vm1421_vm15  ;;  %v1482_v22 = vand.u32 2147483648, %v1383_v26  ;;  %v1480_v3 = vand.u32 2147483647, %v1383_v26  ;;  %vm1476_vm8 = vweird.f32 %v1383_v26 }
 0x7be   :  { %v1417_v52 = vsub.f32 1.0, %v1416_v50 }
 0x7bf   :  { %v1483_v10 = vor.u32 1.1754944e-38, %v1482_v22  ;;  %vm1481_vm10 = vcmp.eq.f32.partialorder %v1480_v3, 8.507059e+37 }
 0x7c0   :  { %v1418_v46 = vmul.f32 %v2120_v37, %v1417_v52 }
 0x7c2   :  { %v1419_v33 = vadd.f32 %v2120_v37, %v1418_v46  ;;  %v1374_v39 = vpop.xlane.xlu1 %1373 }
 0x7c3   :  { %v2122_v57 = vpop.eup %2121  ;;  %2123 = vrcp.f32 %v1374_v39  ;;  %v1438_v7 = vand.u32 2147483647, %v1374_v39  ;;  %v1440_v14 = vand.u32 2147483648, %v1374_v39  ;;  %vm1434_vm12 = vweird.f32 %v1374_v39 }
 0x7c4   :  { %v1423_v59 = vsel %vm1422_vm3, %v2120_v37, %v1419_v33  ;;  %v1472_v60 = vmul.f32 %v2122_v57, %v1383_v26  ;;  %2125 = vrcp.f32 %v2724_v51  ;;  %vm1477_vm5 = vweird.f32 %v2122_v57 }
 0x7c5   :  { %v1428_v61 = vsel %vm1425_vm4, %v1427_v58, %v1423_v59  ;;  %v1114_v63 = vpop.permute.xlu2 %1113  ;;  %vm1478_vm9 = vmor %vm1476_vm8, %vm1477_vm5  ;;  %v1441_v23 = vor.u32 1.1754944e-38, %v1440_v14  ;;  %vm1439_vm14 = vcmp.eq.f32.partialorder %v1438_v7, 8.507059e+37  ;;  %v1468_v37 = vand.u32 2147483648, %v2724_v51 }
 0x7c6   :  { %v1473_v0 = vsub.f32 1.0, %v1472_v60  ;;  %1663 = vmatpush.msrb.mxu3 %v1114_v63  ;;  %v1501_v1 = vmul.f32 %v2684_v11, %v1428_v61  ;;  %vm1462_vm8 = vweird.f32 %v2724_v51  ;;  %v1466_v26 = vand.u32 2147483647, %v2724_v51 }
 0x7c7   :  { %v1469_v33 = vor.u32 1.1754944e-38, %v1468_v37 }
 0x7c8   :  { %v1474_v2 = vmul.f32 %v2122_v57, %v1473_v0  ;;  %2023 = vmatmul.msk.f32.vlgmr.msra.gmra.mxu3 %vm267_vm1, %v1501_v1 }
 0x7c9   :  { %v2124_v4 = vpop.eup %2123 }
 0x7ca   :  { %v1475_v5 = vadd.f32 %v2122_v57, %v1474_v2  ;;  %v1430_v6 = vmul.f32 %v2124_v4, %v1374_v39  ;;  %v1368_v8 = vpop.xlane.xlu1 %1367  ;;  %v2729_v35 = vpop.eup %2125  ;;  %vm1435_vm11 = vweird.f32 %v2124_v4 }
 0x7cb   :  { %2127 = vrcp.f32 %v1368_v8  ;;  %v1458_v15 = vmul.f32 %v2729_v35, %v2724_v51  ;;  %vm1436_vm13 = vmor %vm1434_vm12, %vm1435_vm11  ;;  %v1410_v54 = vand.u32 2147483647, %v1368_v8  ;;  %vm1406_vm2 = vweird.f32 %v1368_v8 }
 0x7cc   :  { %v1479_v12 = vsel %vm1478_vm9, %v2122_v57, %v1475_v5  ;;  %v1431_v41 = vsub.f32 1.0, %v1430_v6  ;;  %vm1463_vm3 = vweird.f32 %v2729_v35 }
 0x7cd   :  { %v1484_v11 = vsel %vm1481_vm10, %v1483_v10, %v1479_v12  ;;  %v1459_v24 = vsub.f32 1.0, %v1458_v15  ;;  %vm1411_vm5 = vcmp.eq.f32.partialorder %v1410_v54, 8.507059e+37  ;;  %vm1464_vm9 = vmor %vm1462_vm8, %vm1463_vm3  ;;  %vm1467_vm10 = vcmp.eq.f32.partialorder %v1466_v26, 8.507059e+37 }
 0x7ce   :  { %v1432_v16 = vmul.f32 %v2124_v4, %v1431_v41  ;;  %v1505_v9 = vmul.f32 %v2688_v17, %v1484_v11  ;;  %v1412_v17 = vand.u32 2147483648, %v1368_v8 }
 0x7cf   :  { %v1118_v20 = vpop.permute.xlu0 %1117  ;;  %v1460_v42 = vmul.f32 %v2729_v35, %v1459_v24 }
 0x7d0   :  { %v1433_v21 = vadd.f32 %v2124_v4, %v1432_v16  ;;  %1594 = vmatpush.msrb.mxu0 %v1118_v20  ;;  %2027 = vmatmul.msk.f32.vlgmr.msrb.gmra.mxu3 %vm267_vm1, %v1505_v9  ;;  %v1413_v34 = vor.u32 1.1754944e-38, %v1412_v17  ;;  %v1722_v17 = vld [vmem:[#allocation8 + $0xe0] sm:$0xff] }
 0x7d1   :  { %v2128_v40 = vpop.eup %2127  ;;  %v1461_v19 = vadd.f32 %v2729_v35, %v1460_v42 }
 0x7d2   :  { %v1437_v25 = vsel %vm1436_vm13, %v2124_v4, %v1433_v21  ;;  %v1402_v27 = vmul.f32 %v2128_v40, %v1368_v8  ;;  %v1386_v28 = vpop.xlane.xlu1 %1385  ;;  %vm1407_vm15 = vweird.f32 %v2128_v40 }
 0x7d3   :  { %v1442_v29 = vsel %vm1439_vm14, %v1441_v23, %v1437_v25  ;;  %2129 = vrcp.f32 %v1386_v28  ;;  %vm1408_vm4 = vmor %vm1406_vm2, %vm1407_vm15  ;;  %v1465_v46 = vsel %vm1464_vm9, %v2729_v35, %v1461_v19  ;;  %v1496_v58 = vand.u32 2147483648, %v1386_v28 }
 0x7d4   :  { %v1403_v32 = vsub.f32 1.0, %v1402_v27  ;;  %v1502_v36 = vmul.f32 %v2696_v44, %v1442_v29  ;;  %v1470_v57 = vsel %vm1467_vm10, %v1469_v33, %v1465_v46  ;;  %vm1490_vm12 = vweird.f32 %v1386_v28  ;;  %v2058_v46 = vld [vmem:[#allocation10 + $0x7] ss:$0 sm:$0xff] }
 0x7d5   :  { %v1494_v59 = vand.u32 2147483647, %v1386_v28  ;;  %v1504_v51 = vmul.f32 %v2690_v18, %v1470_v57  ;;  %v1497_v61 = vor.u32 1.1754944e-38, %v1496_v58 }
 0x7d6   :  { %v1404_v43 = vmul.f32 %v2128_v40, %v1403_v32  ;;  %2024 = vmatmul.msk.f32.vlgmr.msrb.gmra.mxu0 %vm267_vm1, %v1502_v36  ;;  %v1724_v32 = vld [vmem:[#allocation8 + $0xf0] sm:$0xff]  ;;  %v1723_v36 = vld [vmem:[#allocation8 + $0xe8] sm:$0xff] }
 0x7d7   :  { %vm1495_vm14 = vcmp.eq.f32.partialorder %v1494_v59, 8.507059e+37 }
 0x7d8   :  { %v1405_v45 = vadd.f32 %v2128_v40, %v1404_v43 }
 0x7d9   :  { %v2130_v55 = vpop.eup %2129 }
 0x7da   :  { %v1409_v49 = vsel %vm1408_vm4, %v2128_v40, %v1405_v45  ;;  %v1486_v44 = vmul.f32 %v2130_v55, %v1386_v28  ;;  %vm1491_vm11 = vweird.f32 %v2130_v55 }
 0x7db   :  { %v1414_v50 = vsel %vm1411_vm5, %v1413_v34, %v1409_v49  ;;  %vm1492_vm13 = vmor %vm1490_vm12, %vm1491_vm11 }
 0x7dc   :  { %v1487_v52 = vsub.f32 1.0, %v1486_v44  ;;  %v1500_v53 = vmul.f32 %v2700_v31, %v1414_v50 }
 0x7de   :  { %v1488_v48 = vmul.f32 %v2130_v55, %v1487_v52  ;;  %2022 = vmatmul.msk.f32.vlgmr.msrb.gmra.mxu2 %vm267_vm1, %v1500_v53 }
 0x7e0   :  { %v1489_v39 = vadd.f32 %v2130_v55, %v1488_v48 }
 0x7e2   :  { %v1493_v60 = vsel %vm1492_vm13, %v2130_v55, %v1489_v39 }
 0x7e3   :  { %v1498_v31 = vsel %vm1495_vm14, %v1497_v61, %v1493_v60  ;;  %vm1860_vm14 = vcmask 523264  }
 0x7e4   :  { %v1506_v0 = vmul.f32 %v2704_v38, %v1498_v31 }
 0x7e6   :  { %2026 = vmatmul.msk.f32.vlgmr.msra.gmra.mxu2 %vm267_vm1, %v1504_v51 }
 0x7ea   :  { %v1120_v63 = vpop.permute.xlu1 %1119 }
 0x7eb   :  { %1686 = vmatpush.msra.mxu0 %v1120_v63 }
 0x7ec   :  { %2028 = vmatmul.msk.f32.vlgmr.msra.gmra.mxu0 %vm267_vm1, %v1506_v0 }
 0x7fa   :  { %v1365_v1 = vpop.xlane.xlu0 %1364 }
 0x7fb   :  { %2131 = vrcp.f32 %v1365_v1  ;;  %v1398_v18 = vand.u32 2147483648, %v1365_v1  ;;  %v1396_v8 = vand.u32 2147483647, %v1365_v1  ;;  %vm1392_vm2 = vweird.f32 %v1365_v1 }
 0x7fd   :  { %v1399_v38 = vor.u32 1.1754944e-38, %v1398_v18  ;;  %vm1397_vm4 = vcmp.eq.f32.partialorder %v1396_v8, 8.507059e+37  ;;  %v1812_v18 = vld [vmem:[%s2837_s6 + $0x8] sm:$0xff] }
 0x7fe   :  { %v1377_v22 = vpop.xlane.xlu2 %1376 }
 0x7ff   :  { %2133 = vrcp.f32 %v1377_v22  ;;  %v1454_v14 = vand.u32 2147483648, %v1377_v22  ;;  %vm1448_vm8 = vweird.f32 %v1377_v22  ;;  %v1452_v16 = vand.u32 2147483647, %v1377_v22 }
 0x801   :  { %v2132_v2 = vpop.eup %2131  ;;  %v1455_v21 = vor.u32 1.1754944e-38, %v1454_v14  ;;  %vm1453_vm10 = vcmp.eq.f32.partialorder %v1452_v16, 8.507059e+37  ;;  %v1855_v14 = vld [vmem:[%s2839_s8 + $0x28] sm:$0xff] }
 0x802   :  { %v1388_v3 = vmul.f32 %v2132_v2, %v1365_v1  ;;  %vm1393_vm15 = vweird.f32 %v2132_v2 }
 0x803   :  { %vm1394_vm3 = vmor %vm1392_vm2, %vm1393_vm15 }
 0x804   :  { %v1389_v4 = vsub.f32 1.0, %v1388_v3 }
 0x805   :  { %v2134_v5 = vpop.eup %2133 }
 0x806   :  { %v1390_v6 = vmul.f32 %v2132_v2, %v1389_v4  ;;  %v1444_v35 = vmul.f32 %v2134_v5, %v1377_v22  ;;  %vm1449_vm5 = vweird.f32 %v2134_v5 }
 0x807   :  { %vm1450_vm9 = vmor %vm1448_vm8, %vm1449_vm5 }
 0x808   :  { %v1391_v10 = vadd.f32 %v2132_v2, %v1390_v6  ;;  %v1445_v12 = vsub.f32 1.0, %v1444_v35  ;;  %v1811_v6 = vld [vmem:[%s2837_s6] sm:$0xff] }
 0x80a   :  { %v1395_v41 = vsel %vm1394_vm3, %v2132_v2, %v1391_v10  ;;  %v1446_v11 = vmul.f32 %v2134_v5, %v1445_v12 }
 0x80b   :  { %v1400_v7 = vsel %vm1397_vm4, %v1399_v38, %v1395_v41  ;;  %v1857_v41 = vld [vmem:[%s2839_s8 + $0x38] sm:$0xff] }
 0x80c   :  { %v1447_v15 = vadd.f32 %v2134_v5, %v1446_v11  ;;  %v1499_v9 = vmul.f32 %v2716_v47, %v1400_v7  ;;  %v1856_v11 = vld [vmem:[%s2839_s8 + $0x30] sm:$0xff]  ;;  %1875 = vmatpush.msra.mxu3 %v1857_v41 }
 0x80e   :  { %v1451_v20 = vsel %vm1450_vm9, %v2134_v5, %v1447_v15  ;;  %2021 = vmatmul.msk.f32.vlgmr.msrb.gmra.mxu1 %vm267_vm1, %v1499_v9  ;;  %v1813_v5 = vld [vmem:[%s2837_s6 + $0x10] sm:$0xff]  ;;  %1876 = vmatpush.msra.mxu3 %v1856_v11 }
 0x80f   :  { %v1456_v40 = vsel %vm1453_vm10, %v1455_v21, %v1451_v20  ;;  %v1854_v20 = vld [vmem:[%s2839_s8 + $0x20] sm:$0xff] }
 0x810   :  { %v1503_v23 = vmul.f32 %v2720_v30, %v1456_v40  ;;  %v1725_v30 = vld [vmem:[#allocation8 + $0xf8] sm:$0xff]  ;;  %1877 = vmatpush.msra.mxu3 %v1855_v14 }
 0x811   :  { %1746 = vmatpush.msrb.mxu1 %v1725_v30 }
 0x812   :  { %1878 = vmatpush.msra.mxu3 %v1854_v20 }
 0x813   :  { %1747 = vmatpush.msrb.mxu1 %v1724_v32 }
 0x815   :  { %1748 = vmatpush.msrb.mxu1 %v1723_v36 }
 0x816   :  { %2025 = vmatmul.msk.f32.vlgmr.msra.gmra.mxu1 %vm267_vm1, %v1503_v23  ;;  %v1853_v23 = vld [vmem:[%s2839_s8 + $0x18] sm:$0xff] }
 0x817   :  { %1749 = vmatpush.msrb.mxu1 %v1722_v17  ;;  %1879 = vmatpush.msra.mxu3 %v1853_v23 }
 0x84b   :  { %v1573_v27 = vpop.f32.mrf.mxu3 }
 0x853   :  { %v1596_v24 = vpop.f32.mrf.mxu0  ;;  %v1665_v29 = vpop.f32.mrf.mxu3 }
 0x854   :  { %1709 = vrot.lane.b32.xlu1 %v1596_v24, %s2305_s2 }
 0x861   :  { %v1550_v25 = vpop.f32.mrf.mxu2 }
 0x862   :  { %1693 = vrot.lane.b32.xlu1 %v1550_v25, %s2297_s18  ;;  %v2059_v25 = vld [vmem:[#allocation10 + $0xa] ss:$0 sm:$0xff] }
 0x869   :  { %v1688_v28 = vpop.f32.mrf.mxu0  ;;  %v1642_v47 = vpop.f32.mrf.mxu2 }
 0x86a   :  { %1711 = vrot.lane.b32.xlu0 %v1688_v28, %s2305_s2  ;;  %1701 = vrot.lane.b32.xlu1 %v1573_v27, %s2306_s28 }
 0x872   :  { %1695 = vrot.lane.b32.xlu1 %v1642_v47, %s2297_s18  ;;  %v2060_v47 = vld [vmem:[#allocation10 + $0xb] ss:$0 sm:$0xff] }
 0x87a   :  { %1703 = vrot.lane.b32.xlu1 %v1665_v29, %s2306_s28 }
 0x88b   :  { %v1527_v54 = vpop.f32.mrf.mxu1 }
 0x893   :  { %v1619_v44 = vpop.f32.mrf.mxu1 }
 0x8c6   :  { %v1710_v42 = vpop.permute.xlu1 %1709 }
 0x8d4   :  { %v1694_v43 = vpop.permute.xlu1 %1693 }
 0x8d5   :  { %v1715_v45 = vsel %vm267_vm1, %v1527_v54, %v1694_v43 }
 0x8dc   :  { %v1702_v55 = vpop.permute.xlu1 %1701  ;;  %v1712_v26 = vpop.permute.xlu0 %1711 }
 0x8dd   :  { %v1717_v34 = vsel %vm862_vm6, %v1715_v45, %v1702_v55 }
 0x8de   :  { %v1719_v19 = vsel %vm865_vm7, %v1717_v34, %v1710_v42 }
 0x8df   :  { %2029 = vmatmul.msk.f32.vlgmr.msrb.gmra.mxu1 %vm129_vm0, %v1719_v19 }
 0x8e4   :  { %v1696_v49 = vpop.permute.xlu1 %1695 }
 0x8e5   :  { %v1716_v37 = vsel %vm267_vm1, %v1619_v44, %v1696_v49  ;;  %v1852_v49 = vld [vmem:[%s2839_s8 + $0x10] sm:$0xff]  ;;  %v1851_v44 = vld [vmem:[%s2839_s8 + $0x8] sm:$0xff] }
 0x8e6   :  { %1880 = vmatpush.msra.mxu3 %v1852_v49 }
 0x8e8   :  { %1881 = vmatpush.msra.mxu3 %v1851_v44 }
 0x8ec   :  { %v1704_v50 = vpop.permute.xlu1 %1703 }
 0x8ed   :  { %v1718_v52 = vsel %vm862_vm6, %v1716_v37, %v1704_v50  ;;  %v1850_v37 = vld [vmem:[%s2839_s8] sm:$0xff] }
 0x8ee   :  { %v1720_v53 = vsel %vm865_vm7, %v1718_v52, %v1712_v26  ;;  %1882 = vmatpush.msra.mxu3 %v1850_v37  ;;  %v2061_v50 = vld [vmem:[%s2838_s7] ss:$0 sm:$0xff]  ;;  %s2308_s7 = smov [#allocation11]  }
 0x8ef   :  { %2030 = vmatmul.msk.f32.gmra.mxu1 %vm129_vm0, %v1720_v53  ;;  %s1950_s8 = sshll.u32 %s2308_s7, 4  ;;  %s1951_s8 = int_to_ptr.vmem [resolvable:$true] %s1950_s8 }
 0x95c   :  { %v1751_v48 = vpop.f32.mrf.mxu1 }
 0x95d   :  { %v1752_v33 = vadd.f32 %v2058_v46, %v1751_v48 }
 0x95f   :  { %v1757_v39 = vadd.f32 %v1752_v33, %v2618_v56 }
 0x961   :  { %v1759_v57 = vsel %vm129_vm0, %v1757_v39, 0.0 }
 0x962   :  { %1760 = vadd.xlane.f32.xlu2 %v1759_v57 }
 0x96c   :  { %v1754_v58 = vpop.f32.mrf.mxu1 }
 0x96d   :  { %v1755_v59 = vadd.f32 %v2058_v46, %v1754_v58 }
 0x96f   :  { %v1758_v60 = vadd.f32 %v1755_v59, %v2622_v62  ;;  %v1814_v62 = vld [vmem:[%s2837_s6 + $0x18] sm:$0xff] }
 0x970   :  { %1837 = vmatpush.msrb.mxu2 %v1814_v62 }
 0x971   :  { %v1762_v51 = vsel %vm129_vm0, %v1758_v60, 0.0 }
 0x972   :  { %1763 = vadd.xlane.f32.xlu1 %v1762_v51  ;;  %1838 = vmatpush.msrb.mxu2 %v1813_v5 }
 0x974   :  { %1839 = vmatpush.msrb.mxu2 %v1812_v18 }
 0x976   :  { %1840 = vmatpush.msrb.mxu2 %v1811_v6 }
 0x9d5   :  { %v1761_v61 = vpop.xlane.xlu2 %1760 }
 0x9d6   :  { %v1765_v31 = vmul.f32 %v1761_v61, %v2604_v13 }
 0x9d8   :  { %v1767_v63 = vsub.f32 %v1757_v39, %v1765_v31  ;;  %v2062_v39 = vld [vmem:[#allocation10 + $0xe] ss:$0 sm:$0xff] }
 0x9da   :  { %v1769_v0 = vmul.f32 %v1767_v63, %v1767_v63 }
 0x9dc   :  { %v1771_v1 = vsel %vm129_vm0, %v1769_v0, 0.0 }
 0x9dd   :  { %1772 = vadd.xlane.f32.xlu2 %v1771_v1 }
 0x9e5   :  { %v1764_v22 = vpop.xlane.xlu1 %1763 }
 0x9e6   :  { %v1766_v56 = vmul.f32 %v1764_v22, %v2604_v13 }
 0x9e8   :  { %v1768_v2 = vsub.f32 %v1758_v60, %v1766_v56 }
 0x9ea   :  { %v1770_v3 = vmul.f32 %v1768_v2, %v1768_v2 }
 0x9ec   :  { %v1774_v4 = vsel %vm129_vm0, %v1770_v3, 0.0 }
 0x9ed   :  { %1775 = vadd.xlane.f32.xlu2 %v1774_v4 }
 0xa50   :  { %v1773_v8 = vpop.xlane.xlu2 %1772 }
 0xa51   :  { %v1777_v35 = vmul.f32 0.032258064, %v1773_v8 }
 0xa53   :  { %v1780_v10 = vadd.f32 1e-12, %v1777_v35 }
 0xa55   :  { %2135 = vrsqrt.f32 %v1780_v10  ;;  %vm1788_vm6 = vweird.f32 %v1780_v10 }
 0xa5b   :  { %v2136_v12 = vpop.eup %2135 }
 0xa5c   :  { %v1783_v38 = vmul.f32 %v2136_v12, %v1780_v10  ;;  %vm1789_vm1 = vweird.f32 %v2136_v12 }
 0xa5d   :  { %vm1790_vm7 = vmor %vm1788_vm6, %vm1789_vm1 }
 0xa5e   :  { %v1784_v7 = vmul.f32 %v2136_v12, %v1783_v38 }
 0xa60   :  { %v1785_v15 = vmul.f32 0.5, %v1784_v7  ;;  %v1776_v16 = vpop.xlane.xlu2 %1775 }
 0xa61   :  { %v1778_v9 = vmul.f32 0.032258064, %v1776_v16 }
 0xa62   :  { %v1786_v21 = vsub.f32 1.5, %v1785_v15 }
 0xa63   :  { %v1781_v40 = vadd.f32 1e-12, %v1778_v9 }
 0xa64   :  { %v1787_v24 = vmul.f32 %v2136_v12, %v1786_v21  ;;  %v2064_v21 = vld [vmem:[#allocation10 + $0xd] ss:$0 sm:$0xff] }
 0xa65   :  { %2137 = vrsqrt.f32 %v1781_v40  ;;  %vm1798_vm12 = vweird.f32 %v1781_v40 }
 0xa66   :  { %v1791_v27 = vsel %vm1790_vm7, %v2136_v12, %v1787_v24 }
 0xa67   :  { %v1802_v28 = vmul.f32 %v1791_v27, %v1767_v63 }
 0xa69   :  { %v1805_v29 = vmul.f32 %v2059_v25, %v1802_v28 }
 0xa6b   :  { %v2138_v30 = vpop.eup %2137  ;;  %v1809_v32 = vadd.f32 %v2060_v47, %v1805_v29 }
 0xa6c   :  { %v1793_v36 = vmul.f32 %v2138_v30, %v1781_v40  ;;  %vm1799_vm11 = vweird.f32 %v2138_v30 }
 0xa6d   :  { %2031 = vmatmul.msk.f32.vlgmr.msrb.gmra.mxu2 %vm129_vm0, %v1809_v32  ;;  %vm1800_vm13 = vmor %vm1798_vm12, %vm1799_vm11 }
 0xa6e   :  { %v1794_v17 = vmul.f32 %v2138_v30, %v1793_v36 }
 0xa70   :  { %v1795_v42 = vmul.f32 0.5, %v1794_v17 }
 0xa72   :  { %v1796_v43 = vsub.f32 1.5, %v1795_v42 }
 0xa74   :  { %v1797_v54 = vmul.f32 %v2138_v30, %v1796_v43 }
 0xa76   :  { %v1801_v45 = vsel %vm1800_vm13, %v2138_v30, %v1797_v54 }
 0xa77   :  { %v1803_v55 = vmul.f32 %v1801_v45, %v1768_v2 }
 0xa79   :  { %v1806_v34 = vmul.f32 %v2059_v25, %v1803_v55 }
 0xa7b   :  { %v1810_v19 = vadd.f32 %v2060_v47, %v1806_v34 }
 0xa7d   :  { %2032 = vmatmul.msk.f32.gmra.mxu2 %vm129_vm0, %v1810_v19 }
 0xaf0   :  { %v1842_v26 = vpop.f32.mrf.mxu2 }
 0xaf1   :  { %v1843_v52 = vadd.f32 %v2061_v50, %v1842_v26 }
 0xaf3   :  { %v1848_v53 = vmax.f32 %v1843_v52, 0.0 }
 0xaf5   :  { %2033 = vmatmul.msk.f32.vlgmr.msra.gmra.mxu3 %vm1860_vm14, %v1848_v53 }
 0xb00   :  { %v1845_v46 = vpop.f32.mrf.mxu2 }
 0xb01   :  { %v1846_v48 = vadd.f32 %v2061_v50, %v1845_v46 }
 0xb03   :  { %v1849_v33 = vmax.f32 %v1846_v48, 0.0 }
 0xb05   :  { %2034 = vmatmul.msk.f32.gmra.mxu3 %vm1860_vm14, %v1849_v33 }
 0xb78   :  { %v1884_v57 = vpop.f32.mrf.mxu3 }
 0xb79   :  { %v1885_v58 = vadd.f32 %v2062_v39, %v1884_v57 }
 0xb7b   :  { %v1890_v59 = vadd.f32 %v1885_v58, %v1809_v32 }
 0xb7d   :  { %v1892_v60 = vsel %vm129_vm0, %v1890_v59, 0.0 }
 0xb7e   :  { %1893 = vadd.xlane.f32.xlu0 %v1892_v60 }
 0xb88   :  { %v1887_v51 = vpop.f32.mrf.mxu3 }
 0xb89   :  { %v1888_v61 = vadd.f32 %v2062_v39, %v1887_v51 }
 0xb8b   :  { %v1891_v31 = vadd.f32 %v1888_v61, %v1810_v19 }
 0xb8d   :  { %v1895_v63 = vsel %vm129_vm0, %v1891_v31, 0.0 }
 0xb8e   :  { %1896 = vadd.xlane.f32.xlu2 %v1895_v63 }
 0xbf1   :  { %v1894_v0 = vpop.xlane.xlu0 %1893 }
 0xbf2   :  { %v1898_v1 = vmul.f32 %v1894_v0, %v2604_v13 }
 0xbf4   :  { %v1900_v22 = vsub.f32 %v1890_v59, %v1898_v1 }
 0xbf6   :  { %v1902_v56 = vmul.f32 %v1900_v22, %v1900_v22 }
 0xbf8   :  { %v1904_v2 = vsel %vm129_vm0, %v1902_v56, 0.0 }
 0xbf9   :  { %1905 = vadd.xlane.f32.xlu2 %v1904_v2 }
 0xc01   :  { %v1897_v3 = vpop.xlane.xlu2 %1896 }
 0xc02   :  { %v1899_v4 = vmul.f32 %v1897_v3, %v2604_v13  ;;  %v2063_v13 = vld [vmem:[#allocation10 + $0xc] ss:$0 sm:$0xff] }
 0xc04   :  { %v1901_v62 = vsub.f32 %v1891_v31, %v1899_v4 }
 0xc06   :  { %v1903_v5 = vmul.f32 %v1901_v62, %v1901_v62 }
 0xc08   :  { %v1907_v18 = vsel %vm129_vm0, %v1903_v5, 0.0 }
 0xc09   :  { %1908 = vadd.xlane.f32.xlu2 %v1907_v18 }
 0xc6c   :  { %v1906_v6 = vpop.xlane.xlu2 %1905 }
 0xc6d   :  { %v1910_v8 = vmul.f32 0.032258064, %v1906_v6 }
 0xc6f   :  { %v1913_v35 = vadd.f32 1e-12, %v1910_v8 }
 0xc71   :  { %2139 = vrsqrt.f32 %v1913_v35  ;;  %vm1921_vm2 = vweird.f32 %v1913_v35 }
 0xc77   :  { %v2140_v10 = vpop.eup %2139 }
 0xc78   :  { %v1916_v12 = vmul.f32 %v2140_v10, %v1913_v35  ;;  %vm1922_vm15 = vweird.f32 %v2140_v10 }
 0xc79   :  { %vm1923_vm3 = vmor %vm1921_vm2, %vm1922_vm15 }
 0xc7a   :  { %v1917_v38 = vmul.f32 %v2140_v10, %v1916_v12 }
 0xc7c   :  { %v1918_v41 = vmul.f32 0.5, %v1917_v38  ;;  %v1909_v11 = vpop.xlane.xlu2 %1908 }
 0xc7d   :  { %v1911_v7 = vmul.f32 0.032258064, %v1909_v11 }
 0xc7e   :  { %v1919_v14 = vsub.f32 1.5, %v1918_v41 }
 0xc7f   :  { %v1914_v15 = vadd.f32 1e-12, %v1911_v7 }
 0xc80   :  { %v1920_v16 = vmul.f32 %v2140_v10, %v1919_v14 }
 0xc81   :  { %2141 = vrsqrt.f32 %v1914_v15  ;;  %vm1931_vm5 = vweird.f32 %v1914_v15 }
 0xc82   :  { %v1924_v9 = vsel %vm1923_vm3, %v2140_v10, %v1920_v16 }
 0xc83   :  { %v1935_v20 = vmul.f32 %v1924_v9, %v1900_v22 }
 0xc85   :  { %v1938_v40 = vmul.f32 %v2063_v13, %v1935_v20 }
 0xc87   :  { %v2142_v23 = vpop.eup %2141  ;;  %v1942_v24 = vadd.f32 %v2064_v21, %v1938_v40 }
 0xc88   :  { %v1926_v25 = vmul.f32 %v2142_v23, %v1914_v15  ;;  %vm1932_vm4 = vweird.f32 %v2142_v23 }
 0xc89   :  { %1944 = vst.msk [vmem:[#allocation11] sm:$0xff] %vm129_vm0, %v1942_v24  ;;  %vm1933_vm8 = vmor %vm1931_vm5, %vm1932_vm4 }
 0xc8a   :  { %v1927_v27 = vmul.f32 %v2142_v23, %v1926_v25 }
 0xc8c   :  { %v1928_v28 = vmul.f32 0.5, %v1927_v27 }
 0xc8e   :  { %v1929_v47 = vsub.f32 1.5, %v1928_v28 }
 0xc90   :  { %v1930_v29 = vmul.f32 %v2142_v23, %v1929_v47 }
 0xc92   :  { %v1934_v30 = vsel %vm1933_vm8, %v2142_v23, %v1930_v29 }
 0xc93   :  { %v1936_v32 = vmul.f32 %v1934_v30, %v1901_v62 }
 0xc95   :  { %v1939_v36 = vmul.f32 %v2063_v13, %v1936_v32 }
 0xc97   :  { %v1943_v17 = vadd.f32 %v2064_v21, %v1939_v36 }
 0xc99   :  { %1945 = vst.msk [vmem:[#allocation11 + $0x8] sm:$0xff] %vm129_vm0, %v1943_v17 }
 0xc9a   :  { %1958 = dma.vmem_to_hbm [thread:$0]  %s1951_s8, 256, %s1953_s3, [#allocation4], %s2296_s17, %s2296_s17, %s2297_s18  }
 0xc9b   :  { %2293 = dma.done.wait [#allocation4], 256  }
 0xc9c   :  { %2294 = vsyncadd [#allocation4], 4294967040 }
 0xc9d   :  { %1963 = vsyncpa [#allocation3], 1 }
 0xc9e   :  { %1964 = vsyncpa [#allocation6], 1 }
 0xc9f   :  { %1965 = vsyncpa [#allocation9], 1 }
 0xca0   :  { %1966 = vsyncpa [#allocation4], 1 }

</bundles_post_ra>
